<compile_context>
chip_gen: v7x
topology: tpu7x:2x2x1
jax: 0.10.0
libtpu: 0.0.40
codegen_flags: <defaults>
</compile_context>

<pallas_src>
import math

import jax
import jax.numpy as jnp
from jax import lax
from jax.experimental import pallas as pl
from jax.experimental.pallas import tpu as pltpu


# ----------------------------------------------------------------------------
# Pallas conv2d kernel (stride=1, dilation=1, groups=1), NHWC, MXU matmul form
# ----------------------------------------------------------------------------
def _make_conv_kernel(H, W, cin, cout_t, kh, kw, pad):
    hp, wp = H + 2 * pad, W + 2 * pad
    ho, wo = hp - kh + 1, wp - kw + 1
    M = ho * wp  # flat output rows; last (kw-1) columns of each row are slack

    def kernel(x_ref, w_ref, o_ref, xpad_ref):
        # x_ref   : (1, H, W, cin)            bf16   (VMEM, auto-pipelined)
        # w_ref   : (kh*kw, cin, cout_t)      bf16   (VMEM)
        # o_ref   : (1, M, cout_t)            f32    (VMEM)
        # xpad_ref: (hp*wp + wp, cin)         f32    (VMEM scratch; one extra
        #            zero row so every tap slice stays in bounds)
        #
        # 1) Zero-pad the image into the flattened scratch (in-kernel padding,
        #    no HBM round trip).  Re-done every grid step so the kernel stays
        #    correct under megacore sharding of the "parallel" axes.
        xpad_ref[...] = jnp.zeros_like(xpad_ref)
        for h in range(H):  # static loop over image rows
            xpad_ref[pl.ds((pad + h) * wp + pad, W), :] = (
                x_ref[0, h, :, :].astype(jnp.float32))

        # 2) Per-tap MXU contraction over cin, f32 accumulation.
        #    For tap (dh, dw) the contiguous flat slice starting at dh*wp + dw
        #    of length ho*wp contains, at position r*wp + c (c < wo), exactly
        #    xpad[r+dh, c+dw]; columns c >= wo are slack and cropped outside.
        acc = jnp.zeros((M, cout_t), jnp.float32)
        for dh in range(kh):
            for dw in range(kw):
                lhs = xpad_ref[pl.ds(dh * wp + dw, M), :].astype(jnp.bfloat16)
                acc = acc + jnp.dot(lhs, w_ref[dh * kw + dw],
                                    preferred_element_type=jnp.float32)

        o_ref[0, :, :] = acc

    return kernel


def conv2d_nhwc_pallas(x, w, padding, bias=None):
    """Equivalent of F.conv2d(x_nchw, w, bias, stride=1, padding=p, dilation=1,
    groups=1), but operating on / returning NHWC tensors (channels on lanes)."""
    n, H, W, cin = x.shape
    cout, cin_w, kh, kw = w.shape
    assert cin == cin_w, "groups != 1 not supported"
    hp, wp = H + 2 * padding, W + 2 * padding
    ho, wo = hp - kh + 1, wp - kw + 1
    assert ho > 0 and wo > 0
    M = ho * wp

    # bf16 MXU feed (halves HBM/VMEM traffic); accumulation stays f32.
    xb = x.astype(jnp.bfloat16)
    wb = jnp.transpose(w, (2, 3, 1, 0)).reshape(kh * kw, cin, cout).astype(jnp.bfloat16)

    # Output-channel tiling: 256-aligned (v6e/v7x MXU) or 128-aligned (v5e)
    # when divisible, otherwise one full tile (small nets / this test).
    cout_t = cout
    for t in (256, 128):
        if cout % t == 0:
            cout_t = t
            break
    n_ct = cout // cout_t

    kernel = _make_conv_kernel(H, W, cin, cout_t, kh, kw, padding)
    out_flat = pl.pallas_call(
        kernel,
        out_shape=jax.ShapeDtypeStruct((n, M, cout), jnp.float32),
        grid=(n, n_ct),
        in_specs=[
            pl.BlockSpec((1, H, W, cin), lambda b, j: (b, 0, 0, 0)),
            pl.BlockSpec((kh * kw, cin, cout_t), lambda b, j: (0, 0, j)),
        ],
        out_specs=pl.BlockSpec((1, M, cout_t), lambda b, j: (b, 0, j)),
        scratch_shapes=[pltpu.VMEM((hp * wp + wp, cin), jnp.float32)],
        compiler_params=pltpu.CompilerParams(
            dimension_semantics=("parallel", "parallel")),
    )(xb, wb)

    # (N, ho*wp, cout) -> (N, ho, wp, cout), crop the kw-1 slack columns.
    y = out_flat.reshape(n, ho, wp, cout)[:, :, :wo, :]
    if bias is not None:
        # TODO(synk): fold the bias add into the kernel epilogue.
        y = y + bias.astype(jnp.float32)[None, None, None, :]
    return y


# ----------------------------------------------------------------------------
# Cheap resampling ops (bandwidth-bound glue, kept in plain JAX; NHWC)
# ----------------------------------------------------------------------------
def _avg_pool2x2_nhwc(x):
    n, h, w, c = x.shape
    x = x[:, :(h // 2) * 2, :(w // 2) * 2, :].reshape(n, h // 2, 2, w // 2, 2, c)
    return jnp.mean(x, axis=(2, 4))


def _max_pool_nhwc(x, k):
    n, h, w, c = x.shape
    x = x[:, :(h // k) * k, :(w // k) * k, :].reshape(n, h // k, k, w // k, k, c)
    return jnp.max(x, axis=(2, 4))


def _upsample2x_along(x, axis):
    """Bilinear 2x upsample (align_corners=False) along `axis` as a fixed
    stencil (no gathers): even out = 0.75*x + 0.25*x[prev], odd = 0.75*x +
    0.25*x[next], with edge replication."""
    L = x.shape[axis]
    first = lax.slice_in_dim(x, 0, 1, axis=axis)
    last = lax.slice_in_dim(x, L - 1, L, axis=axis)
    prev = jnp.concatenate([first, lax.slice_in_dim(x, 0, L - 1, axis=axis)], axis=axis)
    nxt = jnp.concatenate([lax.slice_in_dim(x, 1, L, axis=axis), last], axis=axis)
    even = 0.75 * x + 0.25 * prev
    odd = 0.75 * x + 0.25 * nxt
    out = jnp.stack([even, odd], axis=axis + 1)
    new_shape = list(x.shape)
    new_shape[axis] = 2 * L
    return out.reshape(new_shape)


def _upsample_bilinear_general_nhwc(x, scale):
    """General gather-based bilinear (align_corners=False); fallback for
    scale != 2 (only reachable with 3+ octave branches)."""
    n, h, w, c = x.shape
    ho, wo = h * scale, w * scale

    def src(lin, lout, s):
        d = jnp.arange(lout, dtype=jnp.float32)
        pos = jnp.maximum((d + 0.5) / s - 0.5, 0.0)
        i0 = jnp.minimum(jnp.floor(pos).astype(jnp.int32), lin - 1)
        lam = pos - i0.astype(jnp.float32)
        i1 = jnp.minimum(i0 + 1, lin - 1)
        return i0, i1, lam

    h0, h1, lh = src(h, ho, float(scale))
    w0, w1, lw = src(w, wo, float(scale))
    rows = (x[:, h0, :, :] * (1.0 - lh)[None, :, None, None]
            + x[:, h1, :, :] * lh[None, :, None, None])
    out = (rows[:, :, w0, :] * (1.0 - lw)[None, None, :, None]
           + rows[:, :, w1, :] * lw[None, None, :, None])
    return out


def _upsample_bilinear_nhwc(x, scale):
    if scale == 2:
        return _upsample2x_along(_upsample2x_along(x, 1), 2)
    return _upsample_bilinear_general_nhwc(x, scale)


# ----------------------------------------------------------------------------
# OctaveConv forward (faithful port of the PyTorch module)
# ----------------------------------------------------------------------------
def init_octave_conv_weight(key, in_channels, out_channels, kernel_size, groups=1):
    shape = (out_channels, int(round(in_channels / groups)),
             kernel_size[0], kernel_size[1])
    fan_in = shape[1] * shape[2] * shape[3]
    bound = 1.0 / math.sqrt(fan_in)  # kaiming_uniform_ with a=sqrt(5)
    return jax.random.uniform(key, shape, jnp.float32, minval=-bound, maxval=bound)


def octave_conv_forward(xset, weight, *, in_channels, out_channels,
                        alpha_in=(0.5, 0.5), alpha_out=(0.5, 0.5),
                        stride=1, padding=1, dilation=1, groups=1, bias=None):
    assert dilation == 1 and groups == 1, "only dilation=1, groups=1 supported"
    if not isinstance(xset, (list, tuple)):
        xset = [xset]

    a_in = [0.0]
    s = 0.0
    for a in alpha_in:
        s += a
        a_in.append(s)
    a_out = [0.0]
    s = 0.0
    for a in alpha_out:
        s += a
        a_out.append(s)
    inbranch, outbranch = len(alpha_in), len(alpha_out)

    # NCHW -> NHWC once at the boundary (channels on the TPU lane axis).
    xs = [None if x is None else jnp.transpose(x, (0, 2, 3, 1)) for x in xset]

    ysets = [[] for _ in range(outbranch)]
    for i in range(inbranch):
        if xs[i] is None:
            continue
        x = _avg_pool2x2_nhwc(xs[i]) if stride == 2 else xs[i]
        begin_x = int(round(in_channels * a_in[i] / groups))
        end_x = int(round(in_channels * a_in[i + 1] / groups))
        if begin_x == end_x:
            continue
        for j in range(outbranch):
            begin_y = int(round(out_channels * a_out[j]))
            end_y = int(round(out_channels * a_out[j + 1]))
            if begin_y == end_y:
                continue
            scale = 2 ** (i - j)
            this_w = weight[begin_y:end_y, begin_x:end_x, :, :]
            this_b = None if bias is None else bias[begin_y:end_y]
            if scale > 1:
                y = conv2d_nhwc_pallas(x, this_w, padding, this_b)
                y = _upsample_bilinear_nhwc(y, int(scale))
            elif scale < 1:
                x_resize = _max_pool_nhwc(x, int(round(1.0 / scale)))
                y = conv2d_nhwc_pallas(x_resize, this_w, padding, this_b)
            else:
                y = conv2d_nhwc_pallas(x, this_w, padding, this_b)
            ysets[j].append(y)

    # TODO(synk): fuse this per-branch sum into the conv epilogue (extra input-
    # branch grid axis + persistent f32 accumulator) to save HBM round trips.
    yset = []
    for j in range(outbranch):
        if ysets[j]:
            acc = ysets[j][0]
            for z in ysets[j][1:]:
                acc = acc + z
            yset.append(jnp.transpose(acc, (0, 3, 1, 2)))  # back to NCHW
        else:
            yset.append(None)
    return yset


if __name__ == "__main__":
    key = jax.random.PRNGKey(0)
    k_w, k_hi, k_lo = jax.random.split(key, 3)

    batch, in_channels, out_channels = 2, 4, 4
    H = W = 16
    kernel_size = (3, 3)
    alpha_in = alpha_out = (0.5, 0.5)

    weight = init_octave_conv_weight(k_w, in_channels, out_channels, kernel_size)

    # Octave input set: high-frequency branch (full res) + low-frequency branch.
    c_hi = in_channels // 2
    c_lo = in_channels - c_hi
    x_high = jax.random.normal(k_hi, (batch, c_hi, H, W), jnp.float32)
    x_low = jax.random.normal(k_lo, (batch, c_lo, H // 2, W // 2), jnp.float32)

    yset = octave_conv_forward([x_high, x_low], weight,
                               in_channels=in_channels,
                               out_channels=out_channels,
                               alpha_in=alpha_in, alpha_out=alpha_out,
                               stride=1, padding=1)

    for y in yset:
        if y is not None:
            jax.block_until_ready(y)

    assert yset[0].shape == (batch, out_channels // 2, H, W)
    assert yset[1].shape == (batch, out_channels // 2, H // 2, W // 2)

    # Correctness spot-check of the Pallas conv against lax.conv on the same
    # bf16-quantized operands (f32 accumulation on both sides).
    x_hi_nhwc = jnp.transpose(x_high, (0, 2, 3, 1))
    w00 = weight[0:2, 0:2]
    y_pal = conv2d_nhwc_pallas(x_hi_nhwc, w00, 1)
    xq = x_hi_nhwc.astype(jnp.bfloat16).astype(jnp.float32)
    wq = w00.astype(jnp.bfloat16).astype(jnp.float32)
    y_ref = lax.conv_general_dilated(
        xq, jnp.transpose(wq, (2, 3, 1, 0)), (1, 1), [(1, 1), (1, 1)],
        dimension_numbers=("NHWC", "HWIO", "NHWC"))
    err = float(jnp.max(jnp.abs(y_pal - y_ref)))
    assert err < 5e-2, f"conv mismatch vs lax.conv reference: max abs err {err}"

    print("KERNEL_OK")
</pallas_src>

<mosaic_0001>
module attributes {stable_mosaic.version = 11 : i64} {
  func.func @kernel(%arg0: i32, %arg1: i32, %arg2: memref<1x16x16x2xbf16, #tpu.memory_space<vmem>>, %arg3: memref<9x2x2xbf16, #tpu.memory_space<vmem>>, %arg4: memref<1x288x2xf32, #tpu.memory_space<vmem>>, %arg5: memref<342x2xf32, #tpu.memory_space<vmem>>) attributes {dimension_semantics = [#tpu.dimension_semantics<parallel>, #tpu.dimension_semantics<parallel>], iteration_bounds = array<i64: 2, 1>, scalar_prefetch = 0 : i64, scratch_operands = 1 : i64, tpu.core_type = #tpu.core_type<tc>, window_params = [{transform_indices = @transform_0, window_bounds = array<i64: 1, 16, 16, 2>}, {transform_indices = @transform_1, window_bounds = array<i64: 9, 2, 2>}, {transform_indices = @transform_2, window_bounds = array<i64: 1, 288, 2>}]} {
    %cst = arith.constant 0.000000e+00 : f32
    %0 = vector.broadcast %cst : f32 to vector<342x2xf32>
    %c0 = arith.constant 0 : index
    %c0_0 = arith.constant 0 : index
    %1 = vector.load %arg5[%c0, %c0_0] : memref<342x2xf32, #tpu.memory_space<vmem>>, vector<342x2xf32>
    tpu.vector_store %arg5[%c0, %c0_0], %0 {strides = array<i32>} : memref<342x2xf32, #tpu.memory_space<vmem>>, vector<342x2xf32>,
    %c0_1 = arith.constant 0 : index
    %c0_2 = arith.constant 0 : index
    %c0_3 = arith.constant 0 : index
    %c0_4 = arith.constant 0 : index
    %2 = vector.load %arg2[%c0_1, %c0_2, %c0_3, %c0_4] : memref<1x16x16x2xbf16, #tpu.memory_space<vmem>>, vector<1x1x16x2xbf16>
    %3 = vector.shape_cast %2 : vector<1x1x16x2xbf16> to vector<16x2xbf16>
    %4 = arith.extf %3 : vector<16x2xbf16> to vector<16x2xf32>
    %c19 = arith.constant 19 : index
    %c0_5 = arith.constant 0 : index
    %5 = vector.load %arg5[%c19, %c0_5] : memref<342x2xf32, #tpu.memory_space<vmem>>, vector<16x2xf32>
    tpu.vector_store %arg5[%c19, %c0_5], %4 {strides = array<i32>} : memref<342x2xf32, #tpu.memory_space<vmem>>, vector<16x2xf32>,
    %c0_6 = arith.constant 0 : index
    %c1 = arith.constant 1 : index
    %c0_7 = arith.constant 0 : index
    %c0_8 = arith.constant 0 : index
    %6 = vector.load %arg2[%c0_6, %c1, %c0_7, %c0_8] : memref<1x16x16x2xbf16, #tpu.memory_space<vmem>>, vector<1x1x16x2xbf16>
    %7 = vector.shape_cast %6 : vector<1x1x16x2xbf16> to vector<16x2xbf16>
    %8 = arith.extf %7 : vector<16x2xbf16> to vector<16x2xf32>
    %c37 = arith.constant 37 : index
    %c0_9 = arith.constant 0 : index
    %9 = vector.load %arg5[%c37, %c0_9] : memref<342x2xf32, #tpu.memory_space<vmem>>, vector<16x2xf32>
    tpu.vector_store %arg5[%c37, %c0_9], %8 {strides = array<i32>} : memref<342x2xf32, #tpu.memory_space<vmem>>, vector<16x2xf32>,
    %c0_10 = arith.constant 0 : index
    %c2 = arith.constant 2 : index
    %c0_11 = arith.constant 0 : index
    %c0_12 = arith.constant 0 : index
    %10 = vector.load %arg2[%c0_10, %c2, %c0_11, %c0_12] : memref<1x16x16x2xbf16, #tpu.memory_space<vmem>>, vector<1x1x16x2xbf16>
    %11 = vector.shape_cast %10 : vector<1x1x16x2xbf16> to vector<16x2xbf16>
    %12 = arith.extf %11 : vector<16x2xbf16> to vector<16x2xf32>
    %c55 = arith.constant 55 : index
    %c0_13 = arith.constant 0 : index
    %13 = vector.load %arg5[%c55, %c0_13] : memref<342x2xf32, #tpu.memory_space<vmem>>, vector<16x2xf32>
    tpu.vector_store %arg5[%c55, %c0_13], %12 {strides = array<i32>} : memref<342x2xf32, #tpu.memory_space<vmem>>, vector<16x2xf32>,
    %c0_14 = arith.constant 0 : index
    %c3 = arith.constant 3 : index
    %c0_15 = arith.constant 0 : index
    %c0_16 = arith.constant 0 : index
    %14 = vector.load %arg2[%c0_14, %c3, %c0_15, %c0_16] : memref<1x16x16x2xbf16, #tpu.memory_space<vmem>>, vector<1x1x16x2xbf16>
    %15 = vector.shape_cast %14 : vector<1x1x16x2xbf16> to vector<16x2xbf16>
    %16 = arith.extf %15 : vector<16x2xbf16> to vector<16x2xf32>
    %c73 = arith.constant 73 : index
    %c0_17 = arith.constant 0 : index
    %17 = vector.load %arg5[%c73, %c0_17] : memref<342x2xf32, #tpu.memory_space<vmem>>, vector<16x2xf32>
    tpu.vector_store %arg5[%c73, %c0_17], %16 {strides = array<i32>} : memref<342x2xf32, #tpu.memory_space<vmem>>, vector<16x2xf32>,
    %c0_18 = arith.constant 0 : index
    %c4 = arith.constant 4 : index
    %c0_19 = arith.constant 0 : index
    %c0_20 = arith.constant 0 : index
    %18 = vector.load %arg2[%c0_18, %c4, %c0_19, %c0_20] : memref<1x16x16x2xbf16, #tpu.memory_space<vmem>>, vector<1x1x16x2xbf16>
    %19 = vector.shape_cast %18 : vector<1x1x16x2xbf16> to vector<16x2xbf16>
    %20 = arith.extf %19 : vector<16x2xbf16> to vector<16x2xf32>
    %c91 = arith.constant 91 : index
    %c0_21 = arith.constant 0 : index
    %21 = vector.load %arg5[%c91, %c0_21] : memref<342x2xf32, #tpu.memory_space<vmem>>, vector<16x2xf32>
    tpu.vector_store %arg5[%c91, %c0_21], %20 {strides = array<i32>} : memref<342x2xf32, #tpu.memory_space<vmem>>, vector<16x2xf32>,
    %c0_22 = arith.constant 0 : index
    %c5 = arith.constant 5 : index
    %c0_23 = arith.constant 0 : index
    %c0_24 = arith.constant 0 : index
    %22 = vector.load %arg2[%c0_22, %c5, %c0_23, %c0_24] : memref<1x16x16x2xbf16, #tpu.memory_space<vmem>>, vector<1x1x16x2xbf16>
    %23 = vector.shape_cast %22 : vector<1x1x16x2xbf16> to vector<16x2xbf16>
    %24 = arith.extf %23 : vector<16x2xbf16> to vector<16x2xf32>
    %c109 = arith.constant 109 : index
    %c0_25 = arith.constant 0 : index
    %25 = vector.load %arg5[%c109, %c0_25] : memref<342x2xf32, #tpu.memory_space<vmem>>, vector<16x2xf32>
    tpu.vector_store %arg5[%c109, %c0_25], %24 {strides = array<i32>} : memref<342x2xf32, #tpu.memory_space<vmem>>, vector<16x2xf32>,
    %c0_26 = arith.constant 0 : index
    %c6 = arith.constant 6 : index
    %c0_27 = arith.constant 0 : index
    %c0_28 = arith.constant 0 : index
    %26 = vector.load %arg2[%c0_26, %c6, %c0_27, %c0_28] : memref<1x16x16x2xbf16, #tpu.memory_space<vmem>>, vector<1x1x16x2xbf16>
    %27 = vector.shape_cast %26 : vector<1x1x16x2xbf16> to vector<16x2xbf16>
    %28 = arith.extf %27 : vector<16x2xbf16> to vector<16x2xf32>
    %c127 = arith.constant 127 : index
    %c0_29 = arith.constant 0 : index
    %29 = vector.load %arg5[%c127, %c0_29] : memref<342x2xf32, #tpu.memory_space<vmem>>, vector<16x2xf32>
    tpu.vector_store %arg5[%c127, %c0_29], %28 {strides = array<i32>} : memref<342x2xf32, #tpu.memory_space<vmem>>, vector<16x2xf32>,
    %c0_30 = arith.constant 0 : index
    %c7 = arith.constant 7 : index
    %c0_31 = arith.constant 0 : index
    %c0_32 = arith.constant 0 : index
    %30 = vector.load %arg2[%c0_30, %c7, %c0_31, %c0_32] : memref<1x16x16x2xbf16, #tpu.memory_space<vmem>>, vector<1x1x16x2xbf16>
    %31 = vector.shape_cast %30 : vector<1x1x16x2xbf16> to vector<16x2xbf16>
    %32 = arith.extf %31 : vector<16x2xbf16> to vector<16x2xf32>
    %c145 = arith.constant 145 : index
    %c0_33 = arith.constant 0 : index
    %33 = vector.load %arg5[%c145, %c0_33] : memref<342x2xf32, #tpu.memory_space<vmem>>, vector<16x2xf32>
    tpu.vector_store %arg5[%c145, %c0_33], %32 {strides = array<i32>} : memref<342x2xf32, #tpu.memory_space<vmem>>, vector<16x2xf32>,
    %c0_34 = arith.constant 0 : index
    %c8 = arith.constant 8 : index
    %c0_35 = arith.constant 0 : index
    %c0_36 = arith.constant 0 : index
    %34 = vector.load %arg2[%c0_34, %c8, %c0_35, %c0_36] : memref<1x16x16x2xbf16, #tpu.memory_space<vmem>>, vector<1x1x16x2xbf16>
    %35 = vector.shape_cast %34 : vector<1x1x16x2xbf16> to vector<16x2xbf16>
    %36 = arith.extf %35 : vector<16x2xbf16> to vector<16x2xf32>
    %c163 = arith.constant 163 : index
    %c0_37 = arith.constant 0 : index
    %37 = vector.load %arg5[%c163, %c0_37] : memref<342x2xf32, #tpu.memory_space<vmem>>, vector<16x2xf32>
    tpu.vector_store %arg5[%c163, %c0_37], %36 {strides = array<i32>} : memref<342x2xf32, #tpu.memory_space<vmem>>, vector<16x2xf32>,
    %c0_38 = arith.constant 0 : index
    %c9 = arith.constant 9 : index
    %c0_39 = arith.constant 0 : index
    %c0_40 = arith.constant 0 : index
    %38 = vector.load %arg2[%c0_38, %c9, %c0_39, %c0_40] : memref<1x16x16x2xbf16, #tpu.memory_space<vmem>>, vector<1x1x16x2xbf16>
    %39 = vector.shape_cast %38 : vector<1x1x16x2xbf16> to vector<16x2xbf16>
    %40 = arith.extf %39 : vector<16x2xbf16> to vector<16x2xf32>
    %c181 = arith.constant 181 : index
    %c0_41 = arith.constant 0 : index
    %41 = vector.load %arg5[%c181, %c0_41] : memref<342x2xf32, #tpu.memory_space<vmem>>, vector<16x2xf32>
    tpu.vector_store %arg5[%c181, %c0_41], %40 {strides = array<i32>} : memref<342x2xf32, #tpu.memory_space<vmem>>, vector<16x2xf32>,
    %c0_42 = arith.constant 0 : index
    %c10 = arith.constant 10 : index
    %c0_43 = arith.constant 0 : index
    %c0_44 = arith.constant 0 : index
    %42 = vector.load %arg2[%c0_42, %c10, %c0_43, %c0_44] : memref<1x16x16x2xbf16, #tpu.memory_space<vmem>>, vector<1x1x16x2xbf16>
    %43 = vector.shape_cast %42 : vector<1x1x16x2xbf16> to vector<16x2xbf16>
    %44 = arith.extf %43 : vector<16x2xbf16> to vector<16x2xf32>
    %c199 = arith.constant 199 : index
    %c0_45 = arith.constant 0 : index
    %45 = vector.load %arg5[%c199, %c0_45] : memref<342x2xf32, #tpu.memory_space<vmem>>, vector<16x2xf32>
    tpu.vector_store %arg5[%c199, %c0_45], %44 {strides = array<i32>} : memref<342x2xf32, #tpu.memory_space<vmem>>, vector<16x2xf32>,
    %c0_46 = arith.constant 0 : index
    %c11 = arith.constant 11 : index
    %c0_47 = arith.constant 0 : index
    %c0_48 = arith.constant 0 : index
    %46 = vector.load %arg2[%c0_46, %c11, %c0_47, %c0_48] : memref<1x16x16x2xbf16, #tpu.memory_space<vmem>>, vector<1x1x16x2xbf16>
    %47 = vector.shape_cast %46 : vector<1x1x16x2xbf16> to vector<16x2xbf16>
    %48 = arith.extf %47 : vector<16x2xbf16> to vector<16x2xf32>
    %c217 = arith.constant 217 : index
    %c0_49 = arith.constant 0 : index
    %49 = vector.load %arg5[%c217, %c0_49] : memref<342x2xf32, #tpu.memory_space<vmem>>, vector<16x2xf32>
    tpu.vector_store %arg5[%c217, %c0_49], %48 {strides = array<i32>} : memref<342x2xf32, #tpu.memory_space<vmem>>, vector<16x2xf32>,
    %c0_50 = arith.constant 0 : index
    %c12 = arith.constant 12 : index
    %c0_51 = arith.constant 0 : index
    %c0_52 = arith.constant 0 : index
    %50 = vector.load %arg2[%c0_50, %c12, %c0_51, %c0_52] : memref<1x16x16x2xbf16, #tpu.memory_space<vmem>>, vector<1x1x16x2xbf16>
    %51 = vector.shape_cast %50 : vector<1x1x16x2xbf16> to vector<16x2xbf16>
    %52 = arith.extf %51 : vector<16x2xbf16> to vector<16x2xf32>
    %c235 = arith.constant 235 : index
    %c0_53 = arith.constant 0 : index
    %53 = vector.load %arg5[%c235, %c0_53] : memref<342x2xf32, #tpu.memory_space<vmem>>, vector<16x2xf32>
    tpu.vector_store %arg5[%c235, %c0_53], %52 {strides = array<i32>} : memref<342x2xf32, #tpu.memory_space<vmem>>, vector<16x2xf32>,
    %c0_54 = arith.constant 0 : index
    %c13 = arith.constant 13 : index
    %c0_55 = arith.constant 0 : index
    %c0_56 = arith.constant 0 : index
    %54 = vector.load %arg2[%c0_54, %c13, %c0_55, %c0_56] : memref<1x16x16x2xbf16, #tpu.memory_space<vmem>>, vector<1x1x16x2xbf16>
    %55 = vector.shape_cast %54 : vector<1x1x16x2xbf16> to vector<16x2xbf16>
    %56 = arith.extf %55 : vector<16x2xbf16> to vector<16x2xf32>
    %c253 = arith.constant 253 : index
    %c0_57 = arith.constant 0 : index
    %57 = vector.load %arg5[%c253, %c0_57] : memref<342x2xf32, #tpu.memory_space<vmem>>, vector<16x2xf32>
    tpu.vector_store %arg5[%c253, %c0_57], %56 {strides = array<i32>} : memref<342x2xf32, #tpu.memory_space<vmem>>, vector<16x2xf32>,
    %c0_58 = arith.constant 0 : index
    %c14 = arith.constant 14 : index
    %c0_59 = arith.constant 0 : index
    %c0_60 = arith.constant 0 : index
    %58 = vector.load %arg2[%c0_58, %c14, %c0_59, %c0_60] : memref<1x16x16x2xbf16, #tpu.memory_space<vmem>>, vector<1x1x16x2xbf16>
    %59 = vector.shape_cast %58 : vector<1x1x16x2xbf16> to vector<16x2xbf16>
    %60 = arith.extf %59 : vector<16x2xbf16> to vector<16x2xf32>
    %c271 = arith.constant 271 : index
    %c0_61 = arith.constant 0 : index
    %61 = vector.load %arg5[%c271, %c0_61] : memref<342x2xf32, #tpu.memory_space<vmem>>, vector<16x2xf32>
    tpu.vector_store %arg5[%c271, %c0_61], %60 {strides = array<i32>} : memref<342x2xf32, #tpu.memory_space<vmem>>, vector<16x2xf32>,
    %c0_62 = arith.constant 0 : index
    %c15 = arith.constant 15 : index
    %c0_63 = arith.constant 0 : index
    %c0_64 = arith.constant 0 : index
    %62 = vector.load %arg2[%c0_62, %c15, %c0_63, %c0_64] : memref<1x16x16x2xbf16, #tpu.memory_space<vmem>>, vector<1x1x16x2xbf16>
    %63 = vector.shape_cast %62 : vector<1x1x16x2xbf16> to vector<16x2xbf16>
    %64 = arith.extf %63 : vector<16x2xbf16> to vector<16x2xf32>
    %c289 = arith.constant 289 : index
    %c0_65 = arith.constant 0 : index
    %65 = vector.load %arg5[%c289, %c0_65] : memref<342x2xf32, #tpu.memory_space<vmem>>, vector<16x2xf32>
    tpu.vector_store %arg5[%c289, %c0_65], %64 {strides = array<i32>} : memref<342x2xf32, #tpu.memory_space<vmem>>, vector<16x2xf32>,
    %cst_66 = arith.constant 0.000000e+00 : f32
    %66 = vector.broadcast %cst_66 : f32 to vector<288x2xf32>
    %c0_67 = arith.constant 0 : index
    %c0_68 = arith.constant 0 : index
    %67 = vector.load %arg5[%c0_67, %c0_68] : memref<342x2xf32, #tpu.memory_space<vmem>>, vector<288x2xf32>
    %68 = arith.truncf %67 : vector<288x2xf32> to vector<288x2xbf16>
    %c0_69 = arith.constant 0 : index
    %c0_70 = arith.constant 0 : index
    %c0_71 = arith.constant 0 : index
    %69 = vector.load %arg3[%c0_69, %c0_70, %c0_71] : memref<9x2x2xbf16, #tpu.memory_space<vmem>>, vector<1x2x2xbf16>
    %70 = vector.shape_cast %69 : vector<1x2x2xbf16> to vector<2x2xbf16>
    %cst_72 = arith.constant dense<0.000000e+00> : vector<288x2xf32>
    %71 = tpu.matmul %68, %70, %cst_72 {dimension_numbers = #tpu.dot_dimension_numbers<[1], [0], [0], [1], [0, 0, 1, 1], [], []>} : vector<288x2xbf16>, vector<2x2xbf16>, vector<288x2xf32> -> vector<288x2xf32>
    %72 = arith.addf %66, %71 : vector<288x2xf32>
    %c1_73 = arith.constant 1 : index
    %c0_74 = arith.constant 0 : index
    %73 = vector.load %arg5[%c1_73, %c0_74] : memref<342x2xf32, #tpu.memory_space<vmem>>, vector<288x2xf32>
    %74 = arith.truncf %73 : vector<288x2xf32> to vector<288x2xbf16>
    %c1_75 = arith.constant 1 : index
    %c0_76 = arith.constant 0 : index
    %c0_77 = arith.constant 0 : index
    %75 = vector.load %arg3[%c1_75, %c0_76, %c0_77] : memref<9x2x2xbf16, #tpu.memory_space<vmem>>, vector<1x2x2xbf16>
    %76 = vector.shape_cast %75 : vector<1x2x2xbf16> to vector<2x2xbf16>
    %cst_78 = arith.constant dense<0.000000e+00> : vector<288x2xf32>
    %77 = tpu.matmul %74, %76, %cst_78 {dimension_numbers = #tpu.dot_dimension_numbers<[1], [0], [0], [1], [0, 0, 1, 1], [], []>} : vector<288x2xbf16>, vector<2x2xbf16>, vector<288x2xf32> -> vector<288x2xf32>
    %78 = arith.addf %72, %77 : vector<288x2xf32>
    %c2_79 = arith.constant 2 : index
    %c0_80 = arith.constant 0 : index
    %79 = vector.load %arg5[%c2_79, %c0_80] : memref<342x2xf32, #tpu.memory_space<vmem>>, vector<288x2xf32>
    %80 = arith.truncf %79 : vector<288x2xf32> to vector<288x2xbf16>
    %c2_81 = arith.constant 2 : index
    %c0_82 = arith.constant 0 : index
    %c0_83 = arith.constant 0 : index
    %81 = vector.load %arg3[%c2_81, %c0_82, %c0_83] : memref<9x2x2xbf16, #tpu.memory_space<vmem>>, vector<1x2x2xbf16>
    %82 = vector.shape_cast %81 : vector<1x2x2xbf16> to vector<2x2xbf16>
    %cst_84 = arith.constant dense<0.000000e+00> : vector<288x2xf32>
    %83 = tpu.matmul %80, %82, %cst_84 {dimension_numbers = #tpu.dot_dimension_numbers<[1], [0], [0], [1], [0, 0, 1, 1], [], []>} : vector<288x2xbf16>, vector<2x2xbf16>, vector<288x2xf32> -> vector<288x2xf32>
    %84 = arith.addf %78, %83 : vector<288x2xf32>
    %c18 = arith.constant 18 : index
    %c0_85 = arith.constant 0 : index
    %85 = vector.load %arg5[%c18, %c0_85] : memref<342x2xf32, #tpu.memory_space<vmem>>, vector<288x2xf32>
    %86 = arith.truncf %85 : vector<288x2xf32> to vector<288x2xbf16>
    %c3_86 = arith.constant 3 : index
    %c0_87 = arith.constant 0 : index
    %c0_88 = arith.constant 0 : index
    %87 = vector.load %arg3[%c3_86, %c0_87, %c0_88] : memref<9x2x2xbf16, #tpu.memory_space<vmem>>, vector<1x2x2xbf16>
    %88 = vector.shape_cast %87 : vector<1x2x2xbf16> to vector<2x2xbf16>
    %cst_89 = arith.constant dense<0.000000e+00> : vector<288x2xf32>
    %89 = tpu.matmul %86, %88, %cst_89 {dimension_numbers = #tpu.dot_dimension_numbers<[1], [0], [0], [1], [0, 0, 1, 1], [], []>} : vector<288x2xbf16>, vector<2x2xbf16>, vector<288x2xf32> -> vector<288x2xf32>
    %90 = arith.addf %84, %89 : vector<288x2xf32>
    %c19_90 = arith.constant 19 : index
    %c0_91 = arith.constant 0 : index
    %91 = vector.load %arg5[%c19_90, %c0_91] : memref<342x2xf32, #tpu.memory_space<vmem>>, vector<288x2xf32>
    %92 = arith.truncf %91 : vector<288x2xf32> to vector<288x2xbf16>
    %c4_92 = arith.constant 4 : index
    %c0_93 = arith.constant 0 : index
    %c0_94 = arith.constant 0 : index
    %93 = vector.load %arg3[%c4_92, %c0_93, %c0_94] : memref<9x2x2xbf16, #tpu.memory_space<vmem>>, vector<1x2x2xbf16>
    %94 = vector.shape_cast %93 : vector<1x2x2xbf16> to vector<2x2xbf16>
    %cst_95 = arith.constant dense<0.000000e+00> : vector<288x2xf32>
    %95 = tpu.matmul %92, %94, %cst_95 {dimension_numbers = #tpu.dot_dimension_numbers<[1], [0], [0], [1], [0, 0, 1, 1], [], []>} : vector<288x2xbf16>, vector<2x2xbf16>, vector<288x2xf32> -> vector<288x2xf32>
    %96 = arith.addf %90, %95 : vector<288x2xf32>
    %c20 = arith.constant 20 : index
    %c0_96 = arith.constant 0 : index
    %97 = vector.load %arg5[%c20, %c0_96] : memref<342x2xf32, #tpu.memory_space<vmem>>, vector<288x2xf32>
    %98 = arith.truncf %97 : vector<288x2xf32> to vector<288x2xbf16>
    %c5_97 = arith.constant 5 : index
    %c0_98 = arith.constant 0 : index
    %c0_99 = arith.constant 0 : index
    %99 = vector.load %arg3[%c5_97, %c0_98, %c0_99] : memref<9x2x2xbf16, #tpu.memory_space<vmem>>, vector<1x2x2xbf16>
    %100 = vector.shape_cast %99 : vector<1x2x2xbf16> to vector<2x2xbf16>
    %cst_100 = arith.constant dense<0.000000e+00> : vector<288x2xf32>
    %101 = tpu.matmul %98, %100, %cst_100 {dimension_numbers = #tpu.dot_dimension_numbers<[1], [0], [0], [1], [0, 0, 1, 1], [], []>} : vector<288x2xbf16>, vector<2x2xbf16>, vector<288x2xf32> -> vector<288x2xf32>
    %102 = arith.addf %96, %101 : vector<288x2xf32>
    %c36 = arith.constant 36 : index
    %c0_101 = arith.constant 0 : index
    %103 = vector.load %arg5[%c36, %c0_101] : memref<342x2xf32, #tpu.memory_space<vmem>>, vector<288x2xf32>
    %104 = arith.truncf %103 : vector<288x2xf32> to vector<288x2xbf16>
    %c6_102 = arith.constant 6 : index
    %c0_103 = arith.constant 0 : index
    %c0_104 = arith.constant 0 : index
    %105 = vector.load %arg3[%c6_102, %c0_103, %c0_104] : memref<9x2x2xbf16, #tpu.memory_space<vmem>>, vector<1x2x2xbf16>
    %106 = vector.shape_cast %105 : vector<1x2x2xbf16> to vector<2x2xbf16>
    %cst_105 = arith.constant dense<0.000000e+00> : vector<288x2xf32>
    %107 = tpu.matmul %104, %106, %cst_105 {dimension_numbers = #tpu.dot_dimension_numbers<[1], [0], [0], [1], [0, 0, 1, 1], [], []>} : vector<288x2xbf16>, vector<2x2xbf16>, vector<288x2xf32> -> vector<288x2xf32>
    %108 = arith.addf %102, %107 : vector<288x2xf32>
    %c37_106 = arith.constant 37 : index
    %c0_107 = arith.constant 0 : index
    %109 = vector.load %arg5[%c37_106, %c0_107] : memref<342x2xf32, #tpu.memory_space<vmem>>, vector<288x2xf32>
    %110 = arith.truncf %109 : vector<288x2xf32> to vector<288x2xbf16>
    %c7_108 = arith.constant 7 : index
    %c0_109 = arith.constant 0 : index
    %c0_110 = arith.constant 0 : index
    %111 = vector.load %arg3[%c7_108, %c0_109, %c0_110] : memref<9x2x2xbf16, #tpu.memory_space<vmem>>, vector<1x2x2xbf16>
    %112 = vector.shape_cast %111 : vector<1x2x2xbf16> to vector<2x2xbf16>
    %cst_111 = arith.constant dense<0.000000e+00> : vector<288x2xf32>
    %113 = tpu.matmul %110, %112, %cst_111 {dimension_numbers = #tpu.dot_dimension_numbers<[1], [0], [0], [1], [0, 0, 1, 1], [], []>} : vector<288x2xbf16>, vector<2x2xbf16>, vector<288x2xf32> -> vector<288x2xf32>
    %114 = arith.addf %108, %113 : vector<288x2xf32>
    %c38 = arith.constant 38 : index
    %c0_112 = arith.constant 0 : index
    %115 = vector.load %arg5[%c38, %c0_112] : memref<342x2xf32, #tpu.memory_space<vmem>>, vector<288x2xf32>
    %116 = arith.truncf %115 : vector<288x2xf32> to vector<288x2xbf16>
    %c8_113 = arith.constant 8 : index
    %c0_114 = arith.constant 0 : index
    %c0_115 = arith.constant 0 : index
    %117 = vector.load %arg3[%c8_113, %c0_114, %c0_115] : memref<9x2x2xbf16, #tpu.memory_space<vmem>>, vector<1x2x2xbf16>
    %118 = vector.shape_cast %117 : vector<1x2x2xbf16> to vector<2x2xbf16>
    %cst_116 = arith.constant dense<0.000000e+00> : vector<288x2xf32>
    %119 = tpu.matmul %116, %118, %cst_116 {dimension_numbers = #tpu.dot_dimension_numbers<[1], [0], [0], [1], [0, 0, 1, 1], [], []>} : vector<288x2xbf16>, vector<2x2xbf16>, vector<288x2xf32> -> vector<288x2xf32>
    %120 = arith.addf %114, %119 : vector<288x2xf32>
    %c0_117 = arith.constant 0 : index
    %c0_118 = arith.constant 0 : index
    %c0_119 = arith.constant 0 : index
    %121 = vector.load %arg4[%c0_117, %c0_118, %c0_119] : memref<1x288x2xf32, #tpu.memory_space<vmem>>, vector<1x288x2xf32>
    %122 = vector.shape_cast %121 : vector<1x288x2xf32> to vector<288x2xf32>
    %123 = vector.shape_cast %120 : vector<288x2xf32> to vector<1x288x2xf32>
    tpu.vector_store %arg4[%c0_117, %c0_118, %c0_119], %123 {strides = array<i32>} : memref<1x288x2xf32, #tpu.memory_space<vmem>>, vector<1x288x2xf32>,
    return
  }
  func.func @transform_0(%arg0: i32, %arg1: i32) -> (i32, i32, i32, i32) {
    %c0_i32 = arith.constant 0 : i32
    %c0_i32_0 = arith.constant 0 : i32
    %c0_i32_1 = arith.constant 0 : i32
    %c0_i32_2 = arith.constant 0 : i32
    return %arg0, %c0_i32, %c0_i32_0, %c0_i32_1 : i32, i32, i32, i32
  }
  func.func @transform_1(%arg0: i32, %arg1: i32) -> (i32, i32, i32) {
    %c0_i32 = arith.constant 0 : i32
    %c0_i32_0 = arith.constant 0 : i32
    %c0_i32_1 = arith.constant 0 : i32
    return %c0_i32, %c0_i32_0, %arg1 : i32, i32, i32
  }
  func.func @transform_2(%arg0: i32, %arg1: i32) -> (i32, i32, i32) {
    %c0_i32 = arith.constant 0 : i32
    %c0_i32_0 = arith.constant 0 : i32
    return %arg0, %c0_i32, %arg1 : i32, i32, i32
  }
}

</mosaic_0001>

<bundles_post_ra>
// kernel: tpu_custom_call.1
= control target key start
LH: loop header
LB: loop body
LE: loop exit
PB: predicated region body
PF: predicated region fallthrough
CT: control target
= control target key end

     0   :  { %s4493_s9 = smov 0   ;;  %s4495_s10 = smov 0   ;;  %s5085_s0 = inlined_call_operand.vmem [shape: bf16[2,16,16,2], index: 0, kind: input, shape index: {}]   ;;  %s5086_s1 = inlined_call_operand.vmem [shape: bf16[9,2,2], index: 1, kind: input, shape index: {}]   ;;  %s5087_s2 = inlined_call_operand.vmem [shape: f32[2,288,2], index: 2, kind: output, shape index: {}]  }
   0x1   :  { %s4497_s11 = smov 0  }
   0x2 LB: > { %s24_s12 = sadd.s32 1, %s4471_s10  ;;  %p3328_p0 = scmp.ge.s32.totalorder %s4475_s11, 1  ;;  %s4475_s11 = sphi %s4497_s11, %s12_s11   ;;  %s4471_s10 = sphi %s4495_s10, %s5089_s10   ;;  %s4467_s9 = sphi %s4493_s9, %s5088_s9  }
   0x3   : > { %p26_p1 = scmp.ge.s32.totalorder %s24_s12, 2  ;;  %p134_p2 = scmp.lt.s32.totalorder %s4475_s11, 3 }
   0x5   : > { %s5091_s12 = smov (%p26_p1, %s24_s12), 0  ;;  %p135_p3 = pnand %p3328_p0, %p134_p2 }
   0x6   : > { %v3362_v0 = vld [vmem:[%s5086_s1 + $0x1] sm:$0x1] (!%p135_p3)  ;;  %vm500_vm0 = vcmask (!%p135_p3), 1040384   ;;  %v4519_v1 = vld [vmem:[%s5086_s1 + $0x4] sm:$0x1] (!%p135_p3)  ;;  %vm179_vm1 = vcmask (!%p135_p3), 15360  }
   0x7   : > { %138 = sbr.rel (%p135_p3) target bundleno = 579 (0x243), region = 28  ;;  %4417 = vmatprep.subr.msk.bf16.mxu1 (!%p135_p3), %vm500_vm0, %v3362_v0  ;;  %4421 = vmatprep.subr.msk.bf16.mxu0 (!%p135_p3), %vm500_vm0, %v4519_v1  ;;  %v502_v2 = vsel (!%p135_p3), %vm500_vm0, %v3362_v0, 0  ;;  %v4527_v3 = vsel (!%p135_p3), %vm500_vm0, %v4519_v1, 0  ;;  %p162_p4 = scmp.lt.s32.totalorder (!%p135_p3), %s4467_s9, 1  ;;  %v4477_v4 = vmov (!%p135_p3), 0.0  }
   0x8   : > { %3786 = vmatpush3.bf16.msra.mxu1 (!%p135_p3), %v502_v2  ;;  %3938 = vmatpush3.bf16.msra.mxu0 (!%p135_p3), %v4527_v3  ;;  %180 = vst.msk [vmem:[#allocation2] sm:$0xff] (!%p135_p3), %vm179_vm1, %v4477_v4  ;;  %181 = vst.msk [vmem:[#allocation2 + $0x8] sm:$0xff] (!%p135_p3), %vm179_vm1, %v4477_v4  ;;  %v4575_v5 = vld [vmem:[%s5086_s1 + $0x5] sm:$0x1] (!%p135_p3)  ;;  %v4580_v6 = vld [vmem:[%s5086_s1] sm:$0x1] (!%p135_p3) }
   0x9   : > { %182 = vst.msk [vmem:[#allocation2 + $0x10] sm:$0xff] (!%p135_p3), %vm179_vm1, %v4477_v4  ;;  %183 = vst.msk [vmem:[#allocation2 + $0x18] sm:$0xff] (!%p135_p3), %vm179_vm1, %v4477_v4  ;;  %4423 = vmatprep.subr.msk.bf16.mxu0 (!%p135_p3), %vm500_vm0, %v4575_v5  ;;  %4418 = vmatprep.subr.msk.bf16.mxu1 (!%p135_p3), %vm500_vm0, %v4580_v6  ;;  %v736_v2 = vsel (!%p135_p3), %vm500_vm0, %v4580_v6, 0  ;;  %v4654_v6 = vld [vmem:[%s5086_s1 + $0x6] sm:$0x1] (!%p135_p3) }
   0xa   : > { %184 = vst.msk [vmem:[#allocation2 + $0x20] sm:$0xff] (!%p135_p3), %vm179_vm1, %v4477_v4  ;;  %185 = vst.msk [vmem:[#allocation2 + $0x28] sm:$0xff] (!%p135_p3), %vm179_vm1, %v4477_v4 }
   0xb   : > { %186 = vst.msk [vmem:[#allocation2 + $0x30] sm:$0xff] (!%p135_p3), %vm179_vm1, %v4477_v4  ;;  %187 = vst.msk [vmem:[#allocation2 + $0x38] sm:$0xff] (!%p135_p3), %vm179_vm1, %v4477_v4 }
   0xc   : > { %188 = vst.msk [vmem:[#allocation2 + $0x40] sm:$0xff] (!%p135_p3), %vm179_vm1, %v4477_v4  ;;  %189 = vst.msk [vmem:[#allocation2 + $0x48] sm:$0xff] (!%p135_p3), %vm179_vm1, %v4477_v4 }
   0xd   : > { %190 = vst.msk [vmem:[#allocation2 + $0x50] sm:$0xff] (!%p135_p3), %vm179_vm1, %v4477_v4  ;;  %191 = vst.msk [vmem:[#allocation2 + $0x58] sm:$0xff] (!%p135_p3), %vm179_vm1, %v4477_v4 }
   0xe   : > { %192 = vst.msk [vmem:[#allocation2 + $0x60] sm:$0xff] %vm179_vm1, %v4477_v4  ;;  %193 = vst.msk [vmem:[#allocation2 + $0x68] sm:$0xff] %vm179_vm1, %v4477_v4  ;;  %s5093_s9 = smov (!%p162_p4, %s4467_s9), 1 }
   0xf   : > { %194 = vst.msk [vmem:[#allocation2 + $0x70] sm:$0xff] %vm179_vm1, %v4477_v4  ;;  %195 = vst.msk [vmem:[#allocation2 + $0x78] sm:$0xff] %vm179_vm1, %v4477_v4  ;;  %s3534_s21 = sshll.u32 %s5093_s9, 7  ;;  %v390_v17 = vld [vmem:[#allocation2 + $0x1] sm:$0xff]  ;;  %s4427_s7 = smul.u32 288, %s5093_s9 }
  0x10   : > { %196 = vst.msk [vmem:[#allocation2 + $0x80] sm:$0xff] %vm179_vm1, %v4477_v4  ;;  %197 = vst.msk [vmem:[#allocation2 + $0x88] sm:$0xff] %vm179_vm1, %v4477_v4  ;;  %s4595_s24 = scalar_lea.vmem %s5085_s0, %s3534_s21  ;;  %v391_v18 = vld [vmem:[#allocation2 + $0x9] sm:$0xff] }
  0x11   : > { %198 = vst.msk [vmem:[#allocation2 + $0x90] sm:$0xff] %vm179_vm1, %v4477_v4  ;;  %199 = vst.msk [vmem:[#allocation2 + $0x98] sm:$0xff] %vm179_vm1, %v4477_v4  ;;  %v3536_v7 = vld [vmem:[%s4595_s24] sm:$0xff]   ;;  %v3599_v8 = vld [vmem:[%s4595_s24 + $0x8] sm:$0xff]   ;;  %v426_v24 = vpack.c.bf16 %v391_v18, %v390_v17  ;;  %s5001_s14 = scalar_lea.vmem %s5087_s2, %s4427_s7 }
  0x12   : > { %200 = vst.msk [vmem:[#allocation2 + $0xa0] sm:$0xff] %vm179_vm1, %v4477_v4  ;;  %201 = vst.msk [vmem:[#allocation2 + $0xa8] sm:$0xff] %vm179_vm1, %v4477_v4  ;;  %v3600_v9 = vld [vmem:[%s4595_s24 + $0x10] sm:$0xff]   ;;  %v3537_v10 = vunpack.c.l.bf16 %v3536_v7  ;;  %v3538_v11 = vunpack.c.h.bf16 %v3536_v7  ;;  %v3541_v12 = vunpack.c.l.bf16 %v3599_v8  ;;  %v3542_v13 = vunpack.c.h.bf16 %v3599_v8  ;;  %v3601_v14 = vld [vmem:[%s4595_s24 + $0x18] sm:$0xff]  }
  0x13   : > { %202 = vst.msk [vmem:[#allocation2 + $0xb0] sm:$0xff] %vm179_vm1, %v4477_v4  ;;  %203 = vst.msk [vmem:[#allocation2 + $0xb8] sm:$0xff] %vm179_vm1, %v4477_v4  ;;  %v3602_v15 = vld [vmem:[%s4595_s24 + $0x20] sm:$0xff]   ;;  %v3603_v16 = vld [vmem:[%s4595_s24 + $0x28] sm:$0xff]   ;;  %v3545_v19 = vunpack.c.l.bf16 %v3600_v9  ;;  %v3546_v20 = vunpack.c.h.bf16 %v3600_v9  ;;  %v3549_v21 = vunpack.c.l.bf16 %v3601_v14  ;;  %v3550_v22 = vunpack.c.h.bf16 %v3601_v14  ;;  %3787 = vmatprep.mubr.msk.bf16.mxu1 %vm179_vm1, %v426_v24 }
  0x14   : > { %204 = vst.msk [vmem:[#allocation2 + $0xc0] sm:$0xff] %vm179_vm1, %v4477_v4  ;;  %205 = vst.msk [vmem:[#allocation2 + $0xc8] sm:$0xff] %vm179_vm1, %v4477_v4  ;;  %v3604_v23 = vld [vmem:[%s4595_s24 + $0x30] sm:$0xff]   ;;  %v3553_v25 = vunpack.c.l.bf16 %v3602_v15  ;;  %v3554_v26 = vunpack.c.h.bf16 %v3602_v15  ;;  %v3557_v27 = vunpack.c.l.bf16 %v3603_v16  ;;  %v3605_v28 = vld [vmem:[%s4595_s24 + $0x38] sm:$0xff]   ;;  %v3558_v31 = vunpack.c.h.bf16 %v3603_v16 }
  0x15   : > { %206 = vst.msk [vmem:[#allocation2 + $0xd0] sm:$0xff] %vm179_vm1, %v4477_v4  ;;  %207 = vst.msk [vmem:[#allocation2 + $0xd8] sm:$0xff] %vm179_vm1, %v4477_v4  ;;  %v3606_v29 = vld [vmem:[%s4595_s24 + $0x40] sm:$0xff]   ;;  %v3607_v30 = vld [vmem:[%s4595_s24 + $0x48] sm:$0xff]   ;;  %v3561_v32 = vunpack.c.l.bf16 %v3604_v23  ;;  %v3562_v33 = vunpack.c.h.bf16 %v3604_v23  ;;  %v3565_v34 = vunpack.c.l.bf16 %v3605_v28  ;;  %v3566_v38 = vunpack.c.h.bf16 %v3605_v28 }
  0x16   : > { %208 = vst.msk [vmem:[#allocation2 + $0xe0] sm:$0xff] %vm179_vm1, %v4477_v4  ;;  %209 = vst.msk [vmem:[#allocation2 + $0xe8] sm:$0xff] %vm179_vm1, %v4477_v4  ;;  %v3608_v35 = vld [vmem:[%s4595_s24 + $0x50] sm:$0xff]   ;;  %v3609_v36 = vld [vmem:[%s4595_s24 + $0x58] sm:$0xff]   ;;  %v3569_v39 = vunpack.c.l.bf16 %v3606_v29  ;;  %v3570_v40 = vunpack.c.h.bf16 %v3606_v29  ;;  %v3573_v41 = vunpack.c.l.bf16 %v3607_v30  ;;  %v3574_v44 = vunpack.c.h.bf16 %v3607_v30 }
  0x17   : > { %210 = vst.msk [vmem:[#allocation2 + $0xf0] sm:$0xff] %vm179_vm1, %v4477_v4  ;;  %211 = vst.msk [vmem:[#allocation2 + $0xf8] sm:$0xff] %vm179_vm1, %v4477_v4  ;;  %v3610_v37 = vld [vmem:[%s4595_s24 + $0x60] sm:$0xff]   ;;  %v3611_v42 = vld [vmem:[%s4595_s24 + $0x68] sm:$0xff]   ;;  %v3577_v45 = vunpack.c.l.bf16 %v3608_v35  ;;  %v3578_v46 = vunpack.c.h.bf16 %v3608_v35  ;;  %v3581_v47 = vunpack.c.l.bf16 %v3609_v36  ;;  %v3582_v49 = vunpack.c.h.bf16 %v3609_v36 }
  0x18   : > { %212 = vst.msk [vmem:[#allocation2 + $0x100] sm:$0xff] %vm179_vm1, %v4477_v4  ;;  %213 = vst.msk [vmem:[#allocation2 + $0x108] sm:$0xff] %vm179_vm1, %v4477_v4  ;;  %v3612_v43 = vld [vmem:[%s4595_s24 + $0x70] sm:$0xff]   ;;  %v3613_v48 = vld [vmem:[%s4595_s24 + $0x78] sm:$0xff]   ;;  %v3585_v50 = vunpack.c.l.bf16 %v3610_v37  ;;  %v3586_v51 = vunpack.c.h.bf16 %v3610_v37  ;;  %v3589_v52 = vunpack.c.l.bf16 %v3611_v42  ;;  %v3590_v53 = vunpack.c.h.bf16 %v3611_v42 }
  0x19   : > { %214 = vst.msk [vmem:[#allocation2 + $0x110] sm:$0xff] %vm179_vm1, %v4477_v4  ;;  %215 = vst.msk [vmem:[#allocation2 + $0x118] sm:$0xff] %vm179_vm1, %v4477_v4  ;;  %v3593_v54 = vunpack.c.l.bf16 %v3612_v43  ;;  %v3594_v55 = vunpack.c.h.bf16 %v3612_v43  ;;  %v3597_v56 = vunpack.c.l.bf16 %v3613_v48  ;;  %v3598_v57 = vunpack.c.h.bf16 %v3613_v48  ;;  %v4660_v17 = vld [vmem:[%s5086_s1 + $0x2] sm:$0x1] }
  0x1a   : > { %216 = vst.msk [vmem:[#allocation2 + $0x120] sm:$0xff] %vm179_vm1, %v4477_v4  ;;  %217 = vst.msk [vmem:[#allocation2 + $0x128] sm:$0xff] %vm179_vm1, %v4477_v4 }
  0x1b   : > { %218 = vst.msk [vmem:[#allocation2 + $0x130] sm:$0xff] %vm179_vm1, %v4477_v4  ;;  %219 = vst.msk [vmem:[#allocation2 + $0x138] sm:$0xff] %vm179_vm1, %v4477_v4 }
  0x1c   : > { %220 = vst.msk [vmem:[#allocation2 + $0x140] sm:$0xff] %vm179_vm1, %v4477_v4  ;;  %228 = vst.msk [vmem:[#allocation2 + $0x13] sm:$0xff] %vm179_vm1, %v3537_v10  ;;  %v2004_v10 = vsel %vm500_vm0, %v4575_v5, 0 }
  0x1d   : > { %229 = vst.msk [vmem:[#allocation2 + $0x1b] sm:$0xff] %vm179_vm1, %v3538_v11  ;;  %235 = vst.msk [vmem:[#allocation2 + $0x25] sm:$0xff] %vm179_vm1, %v3541_v12 }
  0x1e   : > { %236 = vst.msk [vmem:[#allocation2 + $0x2d] sm:$0xff] %vm179_vm1, %v3542_v13  ;;  %242 = vst.msk [vmem:[#allocation2 + $0x37] sm:$0xff] %vm179_vm1, %v3545_v19 }
  0x1f   : > { %243 = vst.msk [vmem:[#allocation2 + $0x3f] sm:$0xff] %vm179_vm1, %v3546_v20  ;;  %249 = vst.msk [vmem:[#allocation2 + $0x49] sm:$0xff] %vm179_vm1, %v3549_v21 }
  0x20   : > { %250 = vst.msk [vmem:[#allocation2 + $0x51] sm:$0xff] %vm179_vm1, %v3550_v22  ;;  %256 = vst.msk [vmem:[#allocation2 + $0x5b] sm:$0xff] %vm179_vm1, %v3553_v25 }
  0x21   : > { %257 = vst.msk [vmem:[#allocation2 + $0x63] sm:$0xff] %vm179_vm1, %v3554_v26  ;;  %263 = vst.msk [vmem:[#allocation2 + $0x6d] sm:$0xff] %vm179_vm1, %v3557_v27 }
  0x22   : > { %264 = vst.msk [vmem:[#allocation2 + $0x75] sm:$0xff] %vm179_vm1, %v3558_v31  ;;  %270 = vst.msk [vmem:[#allocation2 + $0x7f] sm:$0xff] %vm179_vm1, %v3561_v32 }
  0x23   : > { %271 = vst.msk [vmem:[#allocation2 + $0x87] sm:$0xff] %vm179_vm1, %v3562_v33  ;;  %277 = vst.msk [vmem:[#allocation2 + $0x91] sm:$0xff] %vm179_vm1, %v3565_v34  ;;  %v392_v58 = vld [vmem:[#allocation2 + $0x11] sm:$0xff] }
  0x24   : > { %278 = vst.msk [vmem:[#allocation2 + $0x99] sm:$0xff] %vm179_vm1, %v3566_v38  ;;  %284 = vst.msk [vmem:[#allocation2 + $0xa3] sm:$0xff] %vm179_vm1, %v3569_v39  ;;  %v393_v59 = vld [vmem:[#allocation2 + $0x19] sm:$0xff]  ;;  %v1569_v63 = vld [vmem:[#allocation2 + $0x23] sm:$0xff] }
  0x25   : > { %285 = vst.msk [vmem:[#allocation2 + $0xab] sm:$0xff] %vm179_vm1, %v3570_v40  ;;  %291 = vst.msk [vmem:[#allocation2 + $0xb5] sm:$0xff] %vm179_vm1, %v3573_v41  ;;  %v1567_v60 = vld [vmem:[#allocation2 + $0x13] sm:$0xff]  ;;  %v427_v61 = vpack.c.bf16 %v393_v59, %v392_v58  ;;  %v1568_v62 = vld [vmem:[#allocation2 + $0x1b] sm:$0xff] }
  0x26   : > { %292 = vst.msk [vmem:[#allocation2 + $0xbd] sm:$0xff] %vm179_vm1, %v3574_v44  ;;  %298 = vst.msk [vmem:[#allocation2 + $0xc7] sm:$0xff] %vm179_vm1, %v3577_v45  ;;  %v1570_v0 = vld [vmem:[#allocation2 + $0x2b] sm:$0xff]  ;;  %v1603_v4 = vpack.c.bf16 %v1568_v62, %v1567_v60  ;;  %v394_v8 = vld [vmem:[#allocation2 + $0x21] sm:$0xff] }
  0x27   : > { %299 = vst.msk [vmem:[#allocation2 + $0xcf] sm:$0xff] %vm179_vm1, %v3578_v46  ;;  %305 = vst.msk [vmem:[#allocation2 + $0xd9] sm:$0xff] %vm179_vm1, %v3581_v47  ;;  %v1604_v7 = vpack.c.bf16 %v1570_v0, %v1569_v63  ;;  %v395_v9 = vld [vmem:[#allocation2 + $0x29] sm:$0xff]  ;;  %3788 = vmatmul.mubr.msk.bf16.vlgmr.msra.gmra.mrb[0].mxu1 %vm179_vm1, %v427_v61  ;;  %v1571_v12 = vld [vmem:[#allocation2 + $0x33] sm:$0xff] }
  0x28   : > { %306 = vst.msk [vmem:[#allocation2 + $0xe1] sm:$0xff] %vm179_vm1, %v3582_v49  ;;  %312 = vst.msk [vmem:[#allocation2 + $0xeb] sm:$0xff] %vm179_vm1, %v3585_v50  ;;  %v428_v11 = vpack.c.bf16 %v395_v9, %v394_v8  ;;  %v1572_v13 = vld [vmem:[#allocation2 + $0x3b] sm:$0xff]  ;;  %3939 = vmatprep.mubr.msk.bf16.mxu0 %vm179_vm1, %v1603_v4  ;;  %v396_v14 = vld [vmem:[#allocation2 + $0x31] sm:$0xff]  ;;  %3824 = vmatpush3.bf16.msra.mxu1 %v736_v2 }
  0x29   : > { %313 = vst.msk [vmem:[#allocation2 + $0xf3] sm:$0xff] %vm179_vm1, %v3586_v51  ;;  %319 = vst.msk [vmem:[#allocation2 + $0xfd] sm:$0xff] %vm179_vm1, %v3589_v52  ;;  %v397_v15 = vld [vmem:[#allocation2 + $0x39] sm:$0xff]  ;;  %v1605_v16 = vpack.c.bf16 %v1572_v13, %v1571_v12  ;;  %3940 = vmatmul.mubr.msk.bf16.vlgmr.msra.gmra.mrb[0].mxu0 %vm179_vm1, %v1604_v7  ;;  %v398_v5 = vld [vmem:[#allocation2 + $0x41] sm:$0xff]  ;;  %4419 = vmatprep.subr.msk.bf16.mxu1 %vm500_vm0, %v4660_v17 }
  0x2a   : > { %320 = vst.msk [vmem:[#allocation2 + $0x105] sm:$0xff] %vm179_vm1, %v3590_v53  ;;  %326 = vst.msk [vmem:[#allocation2 + $0x10f] sm:$0xff] %vm179_vm1, %v3593_v54  ;;  %3791 = vmatprep.mubr.msk.bf16.mxu1 %vm179_vm1, %v428_v11  ;;  %v399_v18 = vld [vmem:[#allocation2 + $0x49] sm:$0xff]  ;;  %3976 = vmatpush3.bf16.msra.mxu0 %v2004_v10  ;;  %v429_v21 = vpack.c.bf16 %v397_v15, %v396_v14  ;;  %v1575_v22 = vld [vmem:[#allocation2 + $0x53] sm:$0xff]  ;;  %v2330_v15 = vsel %vm500_vm0, %v4654_v6, 0 }
  0x2b   : > { %327 = vst.msk [vmem:[#allocation2 + $0x117] sm:$0xff] %vm179_vm1, %v3594_v55  ;;  %333 = vst.msk [vmem:[#allocation2 + $0x121] sm:$0xff] %vm179_vm1, %v3597_v56  ;;  %3943 = vmatprep.mubr.msk.bf16.mxu0 %vm179_vm1, %v1605_v16  ;;  %v1573_v19 = vld [vmem:[#allocation2 + $0x43] sm:$0xff]  ;;  %v1574_v20 = vld [vmem:[#allocation2 + $0x4b] sm:$0xff]  ;;  %4424 = vmatprep.subr.msk.bf16.mxu0 %vm500_vm0, %v4654_v6  ;;  %v430_v24 = vpack.c.bf16 %v399_v18, %v398_v5 }
  0x2c   : > { %334 = vst.msk [vmem:[#allocation2 + $0x129] sm:$0xff] %vm179_vm1, %v3598_v57  ;;  %v1576_v23 = vld [vmem:[#allocation2 + $0x5b] sm:$0xff]  ;;  %v1606_v25 = vpack.c.bf16 %v1574_v20, %v1573_v19  ;;  %v400_v27 = vld [vmem:[#allocation2 + $0x51] sm:$0xff]  ;;  %v403_v30 = vld [vmem:[#allocation2 + $0x69] sm:$0xff] }
  0x2d   : > { %v1607_v26 = vpack.c.bf16 %v1576_v23, %v1575_v22  ;;  %v401_v28 = vld [vmem:[#allocation2 + $0x59] sm:$0xff]  ;;  %v402_v29 = vld [vmem:[#allocation2 + $0x61] sm:$0xff]  ;;  %v1578_v32 = vld [vmem:[#allocation2 + $0x6b] sm:$0xff] }
  0x2e   : > { %v1577_v31 = vld [vmem:[#allocation2 + $0x63] sm:$0xff]  ;;  %v431_v33 = vpack.c.bf16 %v401_v28, %v400_v27  ;;  %v1579_v34 = vld [vmem:[#allocation2 + $0x73] sm:$0xff]  ;;  %v1580_v35 = vld [vmem:[#allocation2 + $0x7b] sm:$0xff]  ;;  %v432_v36 = vpack.c.bf16 %v403_v30, %v402_v29 }
  0x2f   : > { %3792 = vmatmul.mubr.msk.bf16.gmra.mrb[4].mxu1 %vm179_vm1, %v429_v21  ;;  %v1608_v37 = vpack.c.bf16 %v1578_v32, %v1577_v31  ;;  %v1609_v38 = vpack.c.bf16 %v1580_v35, %v1579_v34  ;;  %v404_v39 = vld [vmem:[#allocation2 + $0x71] sm:$0xff]  ;;  %v405_v40 = vld [vmem:[#allocation2 + $0x79] sm:$0xff]  ;;  %v406_v41 = vld [vmem:[#allocation2 + $0x81] sm:$0xff] }
  0x30   : > { %3795 = vmatprep.mubr.msk.bf16.mxu1 %vm179_vm1, %v430_v24  ;;  %v407_v42 = vld [vmem:[#allocation2 + $0x89] sm:$0xff]  ;;  %v433_v45 = vpack.c.bf16 %v405_v40, %v404_v39  ;;  %v1583_v46 = vld [vmem:[#allocation2 + $0x93] sm:$0xff]  ;;  %v1584_v47 = vld [vmem:[#allocation2 + $0x9b] sm:$0xff] }
  0x31   : > { %3944 = vmatmul.mubr.msk.bf16.gmra.mrb[4].mxu0 %vm179_vm1, %v1606_v25  ;;  %v1581_v43 = vld [vmem:[#allocation2 + $0x83] sm:$0xff]  ;;  %v1582_v44 = vld [vmem:[#allocation2 + $0x8b] sm:$0xff]  ;;  %v434_v48 = vpack.c.bf16 %v407_v42, %v406_v41  ;;  %v1611_v50 = vpack.c.bf16 %v1584_v47, %v1583_v46  ;;  %v409_v52 = vld [vmem:[#allocation2 + $0x99] sm:$0xff] }
  0x32   : > { %3947 = vmatprep.mubr.msk.bf16.mxu0 %vm179_vm1, %v1607_v26  ;;  %v1610_v49 = vpack.c.bf16 %v1582_v44, %v1581_v43  ;;  %v408_v51 = vld [vmem:[#allocation2 + $0x91] sm:$0xff]  ;;  %v410_v53 = vld [vmem:[#allocation2 + $0xa1] sm:$0xff]  ;;  %v411_v54 = vld [vmem:[#allocation2 + $0xa9] sm:$0xff] }
  0x33   : > { %v1585_v55 = vld [vmem:[#allocation2 + $0xa3] sm:$0xff]  ;;  %v1586_v56 = vld [vmem:[#allocation2 + $0xab] sm:$0xff]  ;;  %v435_v57 = vpack.c.bf16 %v409_v52, %v408_v51  ;;  %v1893_v58 = vld [vmem:[#allocation2 + $0x14] sm:$0xff]  ;;  %v436_v60 = vpack.c.bf16 %v411_v54, %v410_v53 }
  0x34   : > { %v1894_v59 = vld [vmem:[#allocation2 + $0x1c] sm:$0xff]  ;;  %v1612_v61 = vpack.c.bf16 %v1586_v56, %v1585_v55  ;;  %v412_v63 = vld [vmem:[#allocation2 + $0xb1] sm:$0xff]  ;;  %v415_v4 = vld [vmem:[#allocation2 + $0xc9] sm:$0xff] }
  0x35   : > { %v1929_v62 = vpack.c.bf16 %v1894_v59, %v1893_v58  ;;  %v413_v0 = vld [vmem:[#allocation2 + $0xb9] sm:$0xff]  ;;  %v414_v2 = vld [vmem:[#allocation2 + $0xc1] sm:$0xff]  ;;  %v1896_v8 = vld [vmem:[#allocation2 + $0x2c] sm:$0xff] }
  0x36   : > { %v1895_v7 = vld [vmem:[#allocation2 + $0x24] sm:$0xff]  ;;  %v437_v9 = vpack.c.bf16 %v413_v0, %v412_v63  ;;  %v1897_v10 = vld [vmem:[#allocation2 + $0x34] sm:$0xff]  ;;  %v1898_v11 = vld [vmem:[#allocation2 + $0x3c] sm:$0xff]  ;;  %v438_v12 = vpack.c.bf16 %v415_v4, %v414_v2  ;;  %v1026_v63 = vsel %vm500_vm0, %v4660_v17, 0 }
  0x37   : > { %3796 = vmatmul.mubr.msk.bf16.gmra.mrb[8].mxu1 %vm179_vm1, %v431_v33  ;;  %v4685_v13 = vpack.c.bf16 %v1896_v8, %v1895_v7  ;;  %v4687_v14 = vpack.c.bf16 %v1898_v11, %v1897_v10  ;;  %v416_v16 = vld [vmem:[#allocation2 + $0xd1] sm:$0xff]  ;;  %v417_v5 = vld [vmem:[#allocation2 + $0xd9] sm:$0xff]  ;;  %v4696_v18 = vld [vmem:[%s5086_s1 + $0x7] sm:$0x1] }
  0x38   : > { %3799 = vmatprep.mubr.msk.bf16.mxu1 %vm179_vm1, %v432_v36  ;;  %v418_v19 = vld [vmem:[#allocation2 + $0xe1] sm:$0xff]  ;;  %v419_v20 = vld [vmem:[#allocation2 + $0xe9] sm:$0xff]  ;;  %v439_v22 = vpack.c.bf16 %v417_v5, %v416_v16  ;;  %v1901_v23 = vld [vmem:[#allocation2 + $0x54] sm:$0xff] }
  0x39   : > { %3948 = vmatmul.mubr.msk.bf16.gmra.mrb[8].mxu0 %vm179_vm1, %v1608_v37  ;;  %v1899_v21 = vld [vmem:[#allocation2 + $0x44] sm:$0xff]  ;;  %v1900_v6 = vld [vmem:[#allocation2 + $0x4c] sm:$0xff]  ;;  %v1902_v24 = vld [vmem:[#allocation2 + $0x5c] sm:$0xff]  ;;  %v440_v25 = vpack.c.bf16 %v419_v20, %v418_v19 }
  0x3a   : > { %3951 = vmatprep.mubr.msk.bf16.mxu0 %vm179_vm1, %v1609_v38  ;;  %v4704_v26 = vpack.c.bf16 %v1900_v6, %v1899_v21  ;;  %v4706_v27 = vpack.c.bf16 %v1902_v24, %v1901_v23  ;;  %v420_v28 = vld [vmem:[#allocation2 + $0xf1] sm:$0xff]  ;;  %v421_v29 = vld [vmem:[#allocation2 + $0xf9] sm:$0xff]  ;;  %v422_v30 = vld [vmem:[#allocation2 + $0x101] sm:$0xff] }
  0x3b   : > { %v423_v31 = vld [vmem:[#allocation2 + $0x109] sm:$0xff]  ;;  %v441_v34 = vpack.c.bf16 %v421_v29, %v420_v28  ;;  %v1905_v35 = vld [vmem:[#allocation2 + $0x74] sm:$0xff]  ;;  %v1906_v36 = vld [vmem:[#allocation2 + $0x7c] sm:$0xff] }
  0x3c   : > { %v1903_v32 = vld [vmem:[#allocation2 + $0x64] sm:$0xff]  ;;  %v1904_v33 = vld [vmem:[#allocation2 + $0x6c] sm:$0xff]  ;;  %v442_v37 = vpack.c.bf16 %v423_v31, %v422_v30  ;;  %v4716_v39 = vpack.c.bf16 %v1906_v36, %v1905_v35  ;;  %v425_v41 = vld [vmem:[#allocation2 + $0x119] sm:$0xff] }
  0x3d   : > { %v4714_v38 = vpack.c.bf16 %v1904_v33, %v1903_v32  ;;  %v424_v40 = vld [vmem:[#allocation2 + $0x111] sm:$0xff]  ;;  %v335_v42 = vld [vmem:[#allocation2] sm:$0xff]  ;;  %v336_v43 = vld [vmem:[#allocation2 + $0x8] sm:$0xff] }
  0x3e   : > { %v1907_v44 = vld [vmem:[#allocation2 + $0x84] sm:$0xff]  ;;  %v443_v46 = vpack.c.bf16 %v425_v41, %v424_v40  ;;  %v1909_v47 = vld [vmem:[#allocation2 + $0x94] sm:$0xff]  ;;  %v4743_v2 = vld [vmem:[%s5086_s1 + $0x3] sm:$0x1] }
  0x3f   : > { %3800 = vmatmul.mubr.msk.bf16.gmra.mrb[12].mxu1 %vm179_vm1, %v433_v45  ;;  %v1908_v45 = vld [vmem:[#allocation2 + $0x8c] sm:$0xff]  ;;  %v338_v53 = vld [vmem:[#allocation2 + $0x18] sm:$0xff]  ;;  %v339_v54 = vld [vmem:[#allocation2 + $0x20] sm:$0xff] }
  0x40   : > { %3803 = vmatprep.mubr.msk.bf16.mxu1 %vm179_vm1, %v434_v48  ;;  %v1910_v48 = vld [vmem:[#allocation2 + $0x9c] sm:$0xff]  ;;  %v337_v52 = vld [vmem:[#allocation2 + $0x10] sm:$0xff]  ;;  %v340_v55 = vld [vmem:[#allocation2 + $0x28] sm:$0xff] }
  0x41   : > { %3952 = vmatmul.mubr.msk.bf16.gmra.mrb[12].mxu0 %vm179_vm1, %v1610_v49  ;;  %v371_v49 = vpack.c.bf16 %v336_v43, %v335_v42  ;;  %v4726_v51 = vpack.c.bf16 %v1910_v48, %v1909_v47  ;;  %v1911_v56 = vld [vmem:[#allocation2 + $0xa4] sm:$0xff]  ;;  %v372_v58 = vpack.c.bf16 %v338_v53, %v337_v52  ;;  %v1913_v59 = vld [vmem:[#allocation2 + $0xb4] sm:$0xff]  ;;  %v1916_v10 = vld [vmem:[#allocation2 + $0xcc] sm:$0xff] }
  0x42   : > { %3955 = vmatprep.mubr.msk.bf16.mxu0 %vm179_vm1, %v1611_v50  ;;  %v4724_v50 = vpack.c.bf16 %v1908_v45, %v1907_v44  ;;  %v341_v4 = vld [vmem:[#allocation2 + $0x30] sm:$0xff]  ;;  %v342_v7 = vld [vmem:[#allocation2 + $0x38] sm:$0xff]  ;;  %v343_v8 = vld [vmem:[#allocation2 + $0x40] sm:$0xff] }
  0x43   : > { %v1915_v17 = vld [vmem:[#allocation2 + $0xc4] sm:$0xff]  ;;  %v374_v11 = vpack.c.bf16 %v342_v7, %v341_v4  ;;  %v345_v20 = vld [vmem:[#allocation2 + $0x50] sm:$0xff]  ;;  %v346_v21 = vld [vmem:[#allocation2 + $0x58] sm:$0xff]  ;;  %v2656_v7 = vsel %vm500_vm0, %v4696_v18, 0 }
  0x44   : > { %v4753_v5 = vpack.c.bf16 %v1916_v10, %v1915_v17  ;;  %v347_v6 = vld [vmem:[#allocation2 + $0x60] sm:$0xff]  ;;  %v1920_v24 = vld [vmem:[#allocation2 + $0xec] sm:$0xff]  ;;  %v1921_v28 = vld [vmem:[#allocation2 + $0xf4] sm:$0xff] }
  0x45   : > { %v1919_v23 = vld [vmem:[#allocation2 + $0xe4] sm:$0xff]  ;;  %v1922_v29 = vld [vmem:[#allocation2 + $0xfc] sm:$0xff]  ;;  %v349_v33 = vld [vmem:[#allocation2 + $0x70] sm:$0xff] }
  0x46   : > { %v4763_v31 = vpack.c.bf16 %v1920_v24, %v1919_v23  ;;  %v4765_v32 = vpack.c.bf16 %v1922_v29, %v1921_v28  ;;  %v351_v35 = vld [vmem:[#allocation2 + $0x80] sm:$0xff]  ;;  %v352_v36 = vld [vmem:[#allocation2 + $0x88] sm:$0xff]  ;;  %v1925_v42 = vld [vmem:[#allocation2 + $0x114] sm:$0xff] }
  0x47   : > { %3804 = vmatmul.mubr.msk.bf16.gmra.mrb[16].mxu1 %vm179_vm1, %v435_v57  ;;  %v1912_v57 = vld [vmem:[#allocation2 + $0xac] sm:$0xff]  ;;  %v1926_v43 = vld [vmem:[#allocation2 + $0x11c] sm:$0xff]  ;;  %v379_v44 = vpack.c.bf16 %v352_v36, %v351_v35  ;;  %v1927_v53 = vld [vmem:[#allocation2 + $0x124] sm:$0xff] }
  0x48   : > { %3807 = vmatprep.mubr.msk.bf16.mxu1 %vm179_vm1, %v436_v60  ;;  %v1914_v60 = vld [vmem:[#allocation2 + $0xbc] sm:$0xff]  ;;  %v1924_v40 = vld [vmem:[#allocation2 + $0x10c] sm:$0xff]  ;;  %v4798_v17 = vld [vmem:[%s5086_s1 + $0x8] sm:$0x1] }
  0x49   : > { %3956 = vmatmul.mubr.msk.bf16.gmra.mrb[16].mxu0 %vm179_vm1, %v1612_v61  ;;  %v373_v61 = vpack.c.bf16 %v340_v55, %v339_v54  ;;  %v4738_v0 = vpack.c.bf16 %v1914_v60, %v1913_v59  ;;  %v353_v47 = vld [vmem:[#allocation2 + $0x90] sm:$0xff]  ;;  %v354_v48 = vld [vmem:[#allocation2 + $0x98] sm:$0xff]  ;;  %v356_v52 = vld [vmem:[#allocation2 + $0xa8] sm:$0xff] }
  0x4a   : > { %3977 = vmatprep.mubr.msk.bf16.mxu0 %vm179_vm1, %v1929_v62  ;;  %v4734_v62 = vpack.c.bf16 %v1912_v57, %v1911_v56  ;;  %v1928_v54 = vld [vmem:[#allocation2 + $0x12c] sm:$0xff]  ;;  %v380_v55 = vpack.c.bf16 %v354_v48, %v353_v47  ;;  %v358_v59 = vld [vmem:[#allocation2 + $0xb8] sm:$0xff]  ;;  %v359_v60 = vld [vmem:[#allocation2 + $0xc0] sm:$0xff] }
  0x4b   : > { %v4783_v57 = vpack.c.bf16 %v1928_v54, %v1927_v53  ;;  %v364_v10 = vld [vmem:[#allocation2 + $0xe8] sm:$0xff]  ;;  %v925_v36 = vld [vmem:[#allocation2 + $0x52] sm:$0xff]  ;;  %v934_v48 = vld [vmem:[#allocation2 + $0x9a] sm:$0xff] }
  0x4c   : > { %v916_v23 = vld [vmem:[#allocation2 + $0xa] sm:$0xff]  ;;  %v919_v28 = vld [vmem:[#allocation2 + $0x22] sm:$0xff]  ;;  %v933_v47 = vld [vmem:[#allocation2 + $0x92] sm:$0xff] }
  0x4d   : > { %v920_v29 = vld [vmem:[#allocation2 + $0x2a] sm:$0xff]  ;;  %v4876_v53 = vpack.c.bf16 %v934_v48, %v933_v47 }
  0x4e   : > { %v2545_v54 = vld [vmem:[#allocation2 + $0x25] sm:$0xff]  ;;  %v2562_v47 = vld [vmem:[#allocation2 + $0xad] sm:$0xff] }
  0x4f   : > { %3808 = vmatmul.mubr.msk.bf16.gmra.mrb[20].mxu1 %vm179_vm1, %v437_v9  ;;  %v344_v9 = vld [vmem:[#allocation2 + $0x48] sm:$0xff] }
  0x50   : > { %3811 = vmatprep.mubr.msk.bf16.mxu1 %vm179_vm1, %v438_v12  ;;  %v1917_v12 = vld [vmem:[#allocation2 + $0xd4] sm:$0xff]  ;;  %v375_v16 = vpack.c.bf16 %v344_v9, %v343_v8 }
  0x51   : > { %3978 = vmatmul.mubr.msk.bf16.vlgmr.msra.gmra.mrb[0].mxu0 %vm179_vm1, %v4685_v13  ;;  %v361_v8 = vld [vmem:[#allocation2 + $0xd0] sm:$0xff]  ;;  %v362_v9 = vld [vmem:[#allocation2 + $0xd8] sm:$0xff] }
  0x52   : > { %4014 = vmatpush3.bf16.msra.mxu0 %v2330_v15  ;;  %3981 = vmatprep.mubr.msk.bf16.mxu0 %vm179_vm1, %v4687_v14  ;;  %v1918_v15 = vld [vmem:[#allocation2 + $0xdc] sm:$0xff] }
  0x53   : > { %4425 = vmatprep.subr.msk.bf16.mxu0 %vm500_vm0, %v4696_v18  ;;  %v4755_v19 = vpack.c.bf16 %v1918_v15, %v1917_v12  ;;  %v365_v12 = vld [vmem:[#allocation2 + $0xf0] sm:$0xff]  ;;  %v366_v15 = vld [vmem:[#allocation2 + $0xf8] sm:$0xff] }
  0x57   : > { %3812 = vmatmul.mubr.msk.bf16.gmra.mrb[24].mxu1 %vm179_vm1, %v439_v22  ;;  %v348_v22 = vld [vmem:[#allocation2 + $0x68] sm:$0xff] }
  0x58   : > { %3815 = vmatprep.mubr.msk.bf16.mxu1 %vm179_vm1, %v440_v25  ;;  %v376_v25 = vpack.c.bf16 %v346_v21, %v345_v20  ;;  %v377_v30 = vpack.c.bf16 %v348_v22, %v347_v6  ;;  %v369_v21 = vld [vmem:[#allocation2 + $0x110] sm:$0xff]  ;;  %v370_v6 = vld [vmem:[#allocation2 + $0x118] sm:$0xff]  ;;  %v915_v22 = vld [vmem:[#allocation2 + $0x2] sm:$0xff] }
  0x59   : > { %3982 = vmatmul.mubr.msk.bf16.gmra.mrb[4].mxu0 %vm179_vm1, %v4704_v26  ;;  %v951_v24 = vpack.c.bf16 %v916_v23, %v915_v22  ;;  %v2554_v22 = vld [vmem:[#allocation2 + $0x6d] sm:$0xff] }
  0x5a   : > { %3985 = vmatprep.mubr.msk.bf16.mxu0 %vm179_vm1, %v4706_v27 }
  0x5f   : > { %3816 = vmatmul.mubr.msk.bf16.gmra.mrb[28].mxu1 %vm179_vm1, %v441_v34  ;;  %v350_v34 = vld [vmem:[#allocation2 + $0x78] sm:$0xff] }
  0x60   : > { %3819 = vmatprep.mubr.msk.bf16.mxu1 %vm179_vm1, %v442_v37  ;;  %v1923_v37 = vld [vmem:[#allocation2 + $0x104] sm:$0xff]  ;;  %v378_v41 = vpack.c.bf16 %v350_v34, %v349_v33  ;;  %v921_v33 = vld [vmem:[#allocation2 + $0x32] sm:$0xff] }
  0x61   : > { %3986 = vmatmul.mubr.msk.bf16.gmra.mrb[8].mxu0 %vm179_vm1, %v4714_v38  ;;  %v4773_v45 = vpack.c.bf16 %v1924_v40, %v1923_v37  ;;  %v924_v34 = vld [vmem:[#allocation2 + $0x4a] sm:$0xff]  ;;  %v927_v37 = vld [vmem:[#allocation2 + $0x62] sm:$0xff] }
  0x62   : > { %3989 = vmatprep.mubr.msk.bf16.mxu0 %vm179_vm1, %v4716_v39 }
  0x67   : > { %3820 = vmatmul.mubr.msk.bf16.gmra.mrb[32].mxu1 %vm179_vm1, %v443_v46  ;;  %v4775_v46 = vpack.c.bf16 %v1926_v43, %v1925_v42  ;;  %v930_v42 = vld [vmem:[#allocation2 + $0x7a] sm:$0xff]  ;;  %v932_v43 = vld [vmem:[#allocation2 + $0x8a] sm:$0xff] }
  0x68   : > { %3825 = vmatprep.mubr.msk.bf16.mxu1 %vm179_vm1, %v371_v49  ;;  %v355_v49 = vld [vmem:[#allocation2 + $0xa0] sm:$0xff] }
  0x69   : > { %3990 = vmatmul.mubr.msk.bf16.gmra.mrb[12].mxu0 %vm179_vm1, %v4724_v50  ;;  %v381_v56 = vpack.c.bf16 %v356_v52, %v355_v49  ;;  %v936_v49 = vld [vmem:[#allocation2 + $0xaa] sm:$0xff]  ;;  %v2254_v52 = vld [vmem:[#allocation2 + $0x13c] sm:$0xff] }
  0x6a   : > { %3993 = vmatprep.mubr.msk.bf16.mxu0 %vm179_vm1, %v4726_v51 }
  0x6f   : > { %3826 = vmatmul.mubr.msk.bf16.vlgmr.msra.gmra.mrb[0].mxu1 %vm179_vm1, %v372_v58  ;;  %v357_v58 = vld [vmem:[#allocation2 + $0xb0] sm:$0xff] }
  0x70   : > { %3829 = vmatprep.mubr.msk.bf16.mxu1 %vm179_vm1, %v373_v61  ;;  %3862 = vmatpush3.bf16.msra.mxu1 %v1026_v63  ;;  %v360_v61 = vld [vmem:[#allocation2 + $0xc8] sm:$0xff]  ;;  %v382_v63 = vpack.c.bf16 %v358_v59, %v357_v58 }
  0x71   : > { %3994 = vmatmul.mubr.msk.bf16.gmra.mrb[16].mxu0 %vm179_vm1, %v4734_v62  ;;  %4420 = vmatprep.subr.msk.bf16.mxu1 %vm500_vm0, %v4743_v2  ;;  %v383_v4 = vpack.c.bf16 %v360_v61, %v359_v60  ;;  %v938_v60 = vld [vmem:[#allocation2 + $0xba] sm:$0xff]  ;;  %v940_v61 = vld [vmem:[#allocation2 + $0xca] sm:$0xff] }
  0x72   : > { %3997 = vmatprep.mubr.msk.bf16.mxu0 %vm179_vm1, %v4738_v0 }
  0x77   : > { %3830 = vmatmul.mubr.msk.bf16.gmra.mrb[4].mxu1 %vm179_vm1, %v374_v11  ;;  %v384_v11 = vpack.c.bf16 %v362_v9, %v361_v8  ;;  %v2549_v8 = vld [vmem:[#allocation2 + $0x45] sm:$0xff]  ;;  %v2550_v9 = vld [vmem:[#allocation2 + $0x4d] sm:$0xff] }
  0x78   : > { %3833 = vmatprep.mubr.msk.bf16.mxu1 %vm179_vm1, %v375_v16  ;;  %v368_v16 = vld [vmem:[#allocation2 + $0x108] sm:$0xff] }
  0x79   : > { %3998 = vmatmul.mubr.msk.bf16.gmra.mrb[20].mxu0 %vm179_vm1, %v4753_v5 }
  0x7a   : > { %4001 = vmatprep.mubr.msk.bf16.mxu0 %vm179_vm1, %v4755_v19 }
  0x7f   : > { %3834 = vmatmul.mubr.msk.bf16.gmra.mrb[8].mxu1 %vm179_vm1, %v376_v25  ;;  %v918_v25 = vld [vmem:[#allocation2 + $0x1a] sm:$0xff] }
  0x80   : > { %3837 = vmatprep.mubr.msk.bf16.mxu1 %vm179_vm1, %v377_v30  ;;  %v4826_v30 = vpack.c.bf16 %v920_v29, %v919_v28  ;;  %v948_v28 = vld [vmem:[#allocation2 + $0x10a] sm:$0xff]  ;;  %v2555_v29 = vld [vmem:[#allocation2 + $0x75] sm:$0xff] }
  0x81   : > { %4002 = vmatmul.mubr.msk.bf16.gmra.mrb[24].mxu0 %vm179_vm1, %v4763_v31 }
  0x82   : > { %4005 = vmatprep.mubr.msk.bf16.mxu0 %vm179_vm1, %v4765_v32 }
  0x87   : > { %3838 = vmatmul.mubr.msk.bf16.gmra.mrb[12].mxu1 %vm179_vm1, %v378_v41  ;;  %v929_v41 = vld [vmem:[#allocation2 + $0x72] sm:$0xff] }
  0x88   : > { %3841 = vmatprep.mubr.msk.bf16.mxu1 %vm179_vm1, %v379_v44 }
  0x89   : > { %4006 = vmatmul.mubr.msk.bf16.gmra.mrb[28].mxu0 %vm179_vm1, %v4773_v45 }
  0x8a   : > { %4009 = vmatprep.mubr.msk.bf16.mxu0 %vm179_vm1, %v4775_v46 }
  0x8f   : > { %3842 = vmatmul.mubr.msk.bf16.gmra.mrb[16].mxu1 %vm179_vm1, %v380_v55  ;;  %v2546_v55 = vld [vmem:[#allocation2 + $0x2d] sm:$0xff] }
  0x90   : > { %3845 = vmatprep.mubr.msk.bf16.mxu1 %vm179_vm1, %v381_v56  ;;  %v2581_v59 = vpack.c.bf16 %v2546_v55, %v2545_v54  ;;  %v2566_v54 = vld [vmem:[#allocation2 + $0xcd] sm:$0xff] }
  0x91   : > { %4010 = vmatmul.mubr.msk.bf16.gmra.mrb[32].mxu0 %vm179_vm1, %v4783_v57 }
  0x92   : > { %4015 = vmatprep.mubr.msk.bf16.mxu0 %vm179_vm1, %v4685_v13  ;;  %v363_v13 = vld [vmem:[#allocation2 + $0xe0] sm:$0xff] }
  0x93   : > { %v385_v18 = vpack.c.bf16 %v364_v10, %v363_v13 }
  0x97   : > { %3846 = vmatmul.mubr.msk.bf16.gmra.mrb[20].mxu1 %vm179_vm1, %v382_v63  ;;  %v2547_v63 = vld [vmem:[#allocation2 + $0x35] sm:$0xff] }
  0x98   : > { %3849 = vmatprep.mubr.msk.bf16.mxu1 %vm179_vm1, %v383_v4  ;;  %v2548_v4 = vld [vmem:[#allocation2 + $0x3d] sm:$0xff] }
  0x99   : > { %4016 = vmatmul.mubr.msk.bf16.vlgmr.msra.gmra.mrb[0].mxu0 %vm179_vm1, %v4687_v14  ;;  %v367_v14 = vld [vmem:[#allocation2 + $0x100] sm:$0xff]  ;;  %v2582_v10 = vpack.c.bf16 %v2548_v4, %v2547_v63  ;;  %v2574_v63 = vld [vmem:[#allocation2 + $0x10d] sm:$0xff] }
  0x9a   : > { %4052 = vmatpush3.bf16.msra.mxu0 %v2656_v7  ;;  %4019 = vmatprep.mubr.msk.bf16.mxu0 %vm179_vm1, %v4704_v26  ;;  %v386_v26 = vpack.c.bf16 %v366_v15, %v365_v12  ;;  %v387_v20 = vpack.c.bf16 %v368_v16, %v367_v14  ;;  %v941_v12 = vld [vmem:[#allocation2 + $0xd2] sm:$0xff]  ;;  %v942_v15 = vld [vmem:[#allocation2 + $0xda] sm:$0xff]  ;;  %v943_v14 = vld [vmem:[#allocation2 + $0xe2] sm:$0xff] }
  0x9b   : > { %4426 = vmatprep.subr.msk.bf16.mxu0 %vm500_vm0, %v4798_v17  ;;  %v944_v16 = vld [vmem:[#allocation2 + $0xea] sm:$0xff] }
  0x9c   : > { %v4900_v23 = vpack.c.bf16 %v944_v16, %v943_v14 }
  0x9f   : > { %3850 = vmatmul.mubr.msk.bf16.gmra.mrb[24].mxu1 %vm179_vm1, %v384_v11  ;;  %v2583_v11 = vpack.c.bf16 %v2550_v9, %v2549_v8  ;;  %v2577_v9 = vld [vmem:[#allocation2 + $0x125] sm:$0xff] }
  0xa0   : > { %3853 = vmatprep.mubr.msk.bf16.mxu1 %vm179_vm1, %v385_v18  ;;  %v2982_v18 = vsel %vm500_vm0, %v4798_v17, 0 }
  0xa1   : > { %4020 = vmatmul.mubr.msk.bf16.gmra.mrb[4].mxu0 %vm179_vm1, %v4706_v27  ;;  %v388_v27 = vpack.c.bf16 %v370_v6, %v369_v21  ;;  %v4898_v21 = vpack.c.bf16 %v942_v15, %v941_v12  ;;  %v2553_v6 = vld [vmem:[#allocation2 + $0x65] sm:$0xff]  ;;  %v2872_v15 = vld [vmem:[#allocation2 + $0x2e] sm:$0xff] }
  0xa2   : > { %4023 = vmatprep.mubr.msk.bf16.mxu0 %vm179_vm1, %v4714_v38  ;;  %v917_v38 = vld [vmem:[#allocation2 + $0x12] sm:$0xff]  ;;  %v2871_v12 = vld [vmem:[#allocation2 + $0x26] sm:$0xff] }
  0xa3   : > { %v2907_v16 = vpack.c.bf16 %v2872_v15, %v2871_v12  ;;  %v2899_v15 = vld [vmem:[#allocation2 + $0x106] sm:$0xff] }
  0xa7   : > { %3854 = vmatmul.mubr.msk.bf16.gmra.mrb[28].mxu1 %vm179_vm1, %v386_v26  ;;  %v2551_v26 = vld [vmem:[#allocation2 + $0x55] sm:$0xff] }
  0xa8   : > { %3857 = vmatprep.mubr.msk.bf16.mxu1 %vm179_vm1, %v387_v20  ;;  %v2552_v20 = vld [vmem:[#allocation2 + $0x5d] sm:$0xff] }
  0xa9   : > { %4024 = vmatmul.mubr.msk.bf16.gmra.mrb[8].mxu0 %vm179_vm1, %v4716_v39  ;;  %v4824_v39 = vpack.c.bf16 %v918_v25, %v917_v38  ;;  %v2584_v17 = vpack.c.bf16 %v2552_v20, %v2551_v26  ;;  %v946_v38 = vld [vmem:[#allocation2 + $0xfa] sm:$0xff]  ;;  %v947_v25 = vld [vmem:[#allocation2 + $0x102] sm:$0xff]  ;;  %v2876_v20 = vld [vmem:[#allocation2 + $0x4e] sm:$0xff] }
  0xaa   : > { %4027 = vmatprep.mubr.msk.bf16.mxu0 %vm179_vm1, %v4724_v50  ;;  %v1352_v50 = vsel %vm500_vm0, %v4743_v2, 0  ;;  %v2875_v26 = vld [vmem:[#allocation2 + $0x46] sm:$0xff] }
  0xaf   : > { %3858 = vmatmul.mubr.msk.bf16.gmra.mrb[32].mxu1 %vm179_vm1, %v388_v27  ;;  %v2585_v27 = vpack.c.bf16 %v2554_v22, %v2553_v6  ;;  %v2909_v22 = vpack.c.bf16 %v2876_v20, %v2875_v26  ;;  %v1601_v26 = vld [vmem:[#allocation2 + $0x123] sm:$0xff]  ;;  %v1602_v20 = vld [vmem:[#allocation2 + $0x12b] sm:$0xff] }
  0xb0   : > { %3863 = vmatprep.mubr.msk.bf16.mxu1 %vm179_vm1, %v951_v24  ;;  %v945_v24 = vld [vmem:[#allocation2 + $0xf2] sm:$0xff] }
  0xb1   : > { %4028 = vmatmul.mubr.msk.bf16.gmra.mrb[12].mxu0 %vm179_vm1, %v4726_v51  ;;  %v922_v51 = vld [vmem:[#allocation2 + $0x3a] sm:$0xff] }
  0xb2   : > { %4031 = vmatprep.mubr.msk.bf16.mxu0 %vm179_vm1, %v4734_v62  ;;  %v923_v62 = vld [vmem:[#allocation2 + $0x42] sm:$0xff]  ;;  %v4840_v2 = vpack.c.bf16 %v922_v51, %v921_v33  ;;  %v4908_v33 = vpack.c.bf16 %v946_v38, %v945_v24 }
  0xb3   : > { %v4842_v35 = vpack.c.bf16 %v924_v34, %v923_v62  ;;  %v2557_v51 = vld [vmem:[#allocation2 + $0x85] sm:$0xff]  ;;  %v2558_v62 = vld [vmem:[#allocation2 + $0x8d] sm:$0xff]  ;;  %v4910_v34 = vpack.c.bf16 %v948_v28, %v947_v25 }
  0xb4   : > { %v2883_v25 = vld [vmem:[#allocation2 + $0x86] sm:$0xff]  ;;  %v2884_v28 = vld [vmem:[#allocation2 + $0x8e] sm:$0xff] }
  0xb7   : > { %3864 = vmatmul.mubr.msk.bf16.vlgmr.msra.gmra.mrb[0].mxu1 %vm179_vm1, %v4824_v39 }
  0xb8   : > { %3867 = vmatprep.mubr.msk.bf16.mxu1 %vm179_vm1, %v4826_v30  ;;  %3900 = vmatpush3.bf16.msra.mxu1 %v1352_v50  ;;  %v2556_v50 = vld [vmem:[#allocation2 + $0x7d] sm:$0xff] }
  0xb9   : > { %4032 = vmatmul.mubr.msk.bf16.gmra.mrb[16].mxu0 %vm179_vm1, %v4738_v0  ;;  %4422 = vmatprep.subr.msk.bf16.mxu1 %vm500_vm0, %v4519_v1  ;;  %v926_v0 = vld [vmem:[#allocation2 + $0x5a] sm:$0xff]  ;;  %v928_v1 = vld [vmem:[#allocation2 + $0x6a] sm:$0xff] }
  0xba   : > { %4035 = vmatprep.mubr.msk.bf16.mxu0 %vm179_vm1, %v4753_v5  ;;  %v4852_v5 = vpack.c.bf16 %v926_v0, %v925_v36  ;;  %v4854_v40 = vpack.c.bf16 %v928_v1, %v927_v37  ;;  %v2586_v36 = vpack.c.bf16 %v2556_v50, %v2555_v29  ;;  %v2587_v0 = vpack.c.bf16 %v2558_v62, %v2557_v51  ;;  %v949_v37 = vld [vmem:[#allocation2 + $0x112] sm:$0xff]  ;;  %v950_v1 = vld [vmem:[#allocation2 + $0x11a] sm:$0xff]  ;;  %v1276_v51 = vld [vmem:[#allocation2 + $0x12a] sm:$0xff] }
  0xbb   : > { %v2913_v50 = vpack.c.bf16 %v2884_v28, %v2883_v25  ;;  %v1588_v62 = vld [vmem:[#allocation2 + $0xbb] sm:$0xff] }
  0xbf   : > { %3868 = vmatmul.mubr.msk.bf16.gmra.mrb[4].mxu1 %vm179_vm1, %v4840_v2 }
  0xc0   : > { %3871 = vmatprep.mubr.msk.bf16.mxu1 %vm179_vm1, %v4842_v35 }
  0xc1   : > { %4036 = vmatmul.mubr.msk.bf16.gmra.mrb[20].mxu0 %vm179_vm1, %v4755_v19  ;;  %v931_v19 = vld [vmem:[#allocation2 + $0x82] sm:$0xff] }
  0xc2   : > { %4039 = vmatprep.mubr.msk.bf16.mxu0 %vm179_vm1, %v4763_v31  ;;  %v4864_v31 = vpack.c.bf16 %v930_v42, %v929_v41  ;;  %v4866_v44 = vpack.c.bf16 %v932_v43, %v931_v19  ;;  %v2559_v41 = vld [vmem:[#allocation2 + $0x95] sm:$0xff]  ;;  %v2560_v42 = vld [vmem:[#allocation2 + $0x9d] sm:$0xff]  ;;  %v4918_v19 = vpack.c.bf16 %v950_v1, %v949_v37  ;;  %v2561_v43 = vld [vmem:[#allocation2 + $0xa5] sm:$0xff] }
  0xc3   : > { %v2588_v48 = vpack.c.bf16 %v2560_v42, %v2559_v41  ;;  %v2887_v1 = vld [vmem:[#allocation2 + $0xa6] sm:$0xff]  ;;  %v2888_v41 = vld [vmem:[#allocation2 + $0xae] sm:$0xff] }
  0xc7   : > { %3872 = vmatmul.mubr.msk.bf16.gmra.mrb[8].mxu1 %vm179_vm1, %v4852_v5 }
  0xc8   : > { %3875 = vmatprep.mubr.msk.bf16.mxu1 %vm179_vm1, %v4854_v40 }
  0xc9   : > { %4040 = vmatmul.mubr.msk.bf16.gmra.mrb[24].mxu0 %vm179_vm1, %v4765_v32  ;;  %v935_v32 = vld [vmem:[#allocation2 + $0xa2] sm:$0xff] }
  0xca   : > { %4043 = vmatprep.mubr.msk.bf16.mxu0 %vm179_vm1, %v4773_v45  ;;  %v2253_v45 = vld [vmem:[#allocation2 + $0x134] sm:$0xff]  ;;  %v4878_v56 = vpack.c.bf16 %v936_v49, %v935_v32  ;;  %v2589_v32 = vpack.c.bf16 %v2562_v47, %v2561_v43  ;;  %v2915_v47 = vpack.c.bf16 %v2888_v41, %v2887_v1 }
  0xcb   : > { %v2272_v58 = vpack.c.bf16 %v2254_v52, %v2253_v45  ;;  %v2563_v49 = vld [vmem:[#allocation2 + $0xb5] sm:$0xff]  ;;  %v2564_v45 = vld [vmem:[#allocation2 + $0xbd] sm:$0xff]  ;;  %v2565_v52 = vld [vmem:[#allocation2 + $0xc5] sm:$0xff] }
  0xcc   : > { %v2590_v55 = vpack.c.bf16 %v2564_v45, %v2563_v49  ;;  %v2889_v49 = vld [vmem:[#allocation2 + $0xb6] sm:$0xff]  ;;  %v2890_v45 = vld [vmem:[#allocation2 + $0xbe] sm:$0xff] }
  0xcf   : > { %3876 = vmatmul.mubr.msk.bf16.gmra.mrb[12].mxu1 %vm179_vm1, %v4864_v31 }
  0xd0   : > { %3879 = vmatprep.mubr.msk.bf16.mxu1 %vm179_vm1, %v4866_v44 }
  0xd1   : > { %4044 = vmatmul.mubr.msk.bf16.gmra.mrb[28].mxu0 %vm179_vm1, %v4775_v46  ;;  %v937_v46 = vld [vmem:[#allocation2 + $0xb2] sm:$0xff] }
  0xd2   : > { %4047 = vmatprep.mubr.msk.bf16.mxu0 %vm179_vm1, %v4783_v57  ;;  %v939_v57 = vld [vmem:[#allocation2 + $0xc2] sm:$0xff]  ;;  %v4886_v7 = vpack.c.bf16 %v938_v60, %v937_v46  ;;  %v2570_v60 = vld [vmem:[#allocation2 + $0xed] sm:$0xff] }
  0xd3   : > { %v4888_v13 = vpack.c.bf16 %v940_v61, %v939_v57  ;;  %v2569_v46 = vld [vmem:[#allocation2 + $0xe5] sm:$0xff] }
  0xd4   : > { %v2593_v61 = vpack.c.bf16 %v2570_v60, %v2569_v46  ;;  %v1593_v46 = vld [vmem:[#allocation2 + $0xe3] sm:$0xff]  ;;  %v1594_v60 = vld [vmem:[#allocation2 + $0xeb] sm:$0xff] }
  0xd7   : > { %3880 = vmatmul.mubr.msk.bf16.gmra.mrb[16].mxu1 %vm179_vm1, %v4876_v53 }
  0xd8   : > { %3883 = vmatprep.mubr.msk.bf16.mxu1 %vm179_vm1, %v4878_v56 }
  0xd9   : > { %4048 = vmatmul.mubr.msk.bf16.gmra.mrb[32].mxu0 %vm179_vm1, %v2272_v58  ;;  %v2591_v58 = vpack.c.bf16 %v2566_v54, %v2565_v52  ;;  %v2891_v54 = vld [vmem:[#allocation2 + $0xc6] sm:$0xff] }
  0xda   : > { %4053 = vmatprep.mubr.msk.bf16.mxu0 %vm179_vm1, %v2581_v59  ;;  %v2568_v59 = vld [vmem:[#allocation2 + $0xdd] sm:$0xff] }
  0xdf   : > { %3884 = vmatmul.mubr.msk.bf16.gmra.mrb[20].mxu1 %vm179_vm1, %v4886_v7 }
  0xe0   : > { %3887 = vmatprep.mubr.msk.bf16.mxu1 %vm179_vm1, %v4888_v13 }
  0xe1   : > { %4054 = vmatmul.mubr.msk.bf16.vlgmr.msra.gmra.mrb[0].mxu0 %vm179_vm1, %v2582_v10  ;;  %v2578_v10 = vld [vmem:[#allocation2 + $0x12d] sm:$0xff] }
  0xe2   : > { %4090 = vmatpush3.bf16.msra.mxu0 %v2982_v18  ;;  %4057 = vmatprep.mubr.msk.bf16.mxu0 %vm179_vm1, %v2583_v11  ;;  %v2597_v18 = vpack.c.bf16 %v2578_v10, %v2577_v9  ;;  %v1597_v9 = vld [vmem:[#allocation2 + $0x103] sm:$0xff]  ;;  %v1598_v10 = vld [vmem:[#allocation2 + $0x10b] sm:$0xff] }
  0xe3   : > { %v1618_v12 = vpack.c.bf16 %v1598_v10, %v1597_v9 }
  0xe7   : > { %3888 = vmatmul.mubr.msk.bf16.gmra.mrb[24].mxu1 %vm179_vm1, %v4898_v21 }
  0xe8   : > { %3891 = vmatprep.mubr.msk.bf16.mxu1 %vm179_vm1, %v4900_v23 }
  0xe9   : > { %4058 = vmatmul.mubr.msk.bf16.gmra.mrb[4].mxu0 %vm179_vm1, %v2584_v17  ;;  %v2879_v17 = vld [vmem:[#allocation2 + $0x66] sm:$0xff] }
  0xea   : > { %4061 = vmatprep.mubr.msk.bf16.mxu0 %vm179_vm1, %v2585_v27  ;;  %v2880_v27 = vld [vmem:[#allocation2 + $0x6e] sm:$0xff] }
  0xeb   : > { %v2911_v38 = vpack.c.bf16 %v2880_v27, %v2879_v17  ;;  %v2904_v17 = vld [vmem:[#allocation2 + $0x12e] sm:$0xff] }
  0xef   : > { %3892 = vmatmul.mubr.msk.bf16.gmra.mrb[28].mxu1 %vm179_vm1, %v4908_v33 }
  0xf0   : > { %3895 = vmatprep.mubr.msk.bf16.mxu1 %vm179_vm1, %v4910_v34 }
  0xf1   : > { %4062 = vmatmul.mubr.msk.bf16.gmra.mrb[8].mxu0 %vm179_vm1, %v2586_v36  ;;  %v2885_v36 = vld [vmem:[#allocation2 + $0x96] sm:$0xff] }
  0xf2   : > { %4065 = vmatprep.mubr.msk.bf16.mxu0 %vm179_vm1, %v2587_v0  ;;  %v2886_v0 = vld [vmem:[#allocation2 + $0x9e] sm:$0xff] }
  0xf3   : > { %v2914_v43 = vpack.c.bf16 %v2886_v0, %v2885_v36 }
  0xf7   : > { %3896 = vmatmul.mubr.msk.bf16.gmra.mrb[32].mxu1 %vm179_vm1, %v4918_v19 }
  0xf8   : > { %3901 = vmatprep.mubr.msk.bf16.mxu1 %vm179_vm1, %v4824_v39  ;;  %v2567_v39 = vld [vmem:[#allocation2 + $0xd5] sm:$0xff] }
  0xf9   : > { %4066 = vmatmul.mubr.msk.bf16.gmra.mrb[12].mxu0 %vm179_vm1, %v2588_v48  ;;  %v2592_v57 = vpack.c.bf16 %v2568_v59, %v2567_v39  ;;  %v1591_v48 = vld [vmem:[#allocation2 + $0xd3] sm:$0xff]  ;;  %v2916_v39 = vpack.c.bf16 %v2890_v45, %v2889_v49 }
  0xfa   : > { %4069 = vmatprep.mubr.msk.bf16.mxu0 %vm179_vm1, %v2589_v32  ;;  %v1592_v32 = vld [vmem:[#allocation2 + $0xdb] sm:$0xff] }
  0xff   : > { %3902 = vmatmul.mubr.msk.bf16.vlgmr.msra.gmra.mrb[0].mxu1 %vm179_vm1, %v4826_v30  ;;  %v2572_v30 = vld [vmem:[#allocation2 + $0xfd] sm:$0xff] }
 0x100   : > { %3905 = vmatprep.mubr.msk.bf16.mxu1 %vm179_vm1, %v4840_v2  ;;  %4128 = vmatpush3.bf16.msra.mxu1 %v4527_v3  ;;  %v2571_v3 = vld [vmem:[#allocation2 + $0xf5] sm:$0xff]  ;;  %v2573_v2 = vld [vmem:[#allocation2 + $0x105] sm:$0xff] }
 0x101   : > { %4070 = vmatmul.mubr.msk.bf16.gmra.mrb[16].mxu0 %vm179_vm1, %v2590_v55  ;;  %v2594_v4 = vpack.c.bf16 %v2572_v30, %v2571_v3  ;;  %v2595_v8 = vpack.c.bf16 %v2574_v63, %v2573_v2  ;;  %v2892_v55 = vld [vmem:[#allocation2 + $0xce] sm:$0xff]  ;;  %v2893_v3 = vld [vmem:[#allocation2 + $0xd6] sm:$0xff]  ;;  %v2894_v30 = vld [vmem:[#allocation2 + $0xde] sm:$0xff]  ;;  %v1616_v2 = vpack.c.bf16 %v1594_v60, %v1593_v46 }
 0x102   : > { %4073 = vmatprep.mubr.msk.bf16.mxu0 %vm179_vm1, %v2591_v58  ;;  %v1615_v58 = vpack.c.bf16 %v1592_v32, %v1591_v48  ;;  %v2917_v59 = vpack.c.bf16 %v2892_v55, %v2891_v54  ;;  %v2895_v63 = vld [vmem:[#allocation2 + $0xe6] sm:$0xff] }
 0x107   : > { %3906 = vmatmul.mubr.msk.bf16.gmra.mrb[4].mxu1 %vm179_vm1, %v4842_v35  ;;  %v2575_v35 = vld [vmem:[#allocation2 + $0x115] sm:$0xff] }
 0x108   : > { %3909 = vmatprep.mubr.msk.bf16.mxu1 %vm179_vm1, %v4852_v5  ;;  %v2576_v5 = vld [vmem:[#allocation2 + $0x11d] sm:$0xff] }
 0x109   : > { %4074 = vmatmul.mubr.msk.bf16.gmra.mrb[20].mxu0 %vm179_vm1, %v2592_v57  ;;  %v2596_v11 = vpack.c.bf16 %v2576_v5, %v2575_v35  ;;  %v1595_v57 = vld [vmem:[#allocation2 + $0xf3] sm:$0xff]  ;;  %v2918_v35 = vpack.c.bf16 %v2894_v30, %v2893_v3 }
 0x10a   : > { %4077 = vmatprep.mubr.msk.bf16.mxu0 %vm179_vm1, %v2593_v61  ;;  %v1596_v61 = vld [vmem:[#allocation2 + $0xfb] sm:$0xff] }
 0x10f   : > { %3910 = vmatmul.mubr.msk.bf16.gmra.mrb[8].mxu1 %vm179_vm1, %v4854_v40  ;;  %v2579_v40 = vld [vmem:[#allocation2 + $0x135] sm:$0xff] }
 0x110   : > { %3913 = vmatprep.mubr.msk.bf16.mxu1 %vm179_vm1, %v4864_v31  ;;  %v2580_v31 = vld [vmem:[#allocation2 + $0x13d] sm:$0xff] }
 0x111   : > { %4078 = vmatmul.mubr.msk.bf16.gmra.mrb[24].mxu0 %vm179_vm1, %v2594_v4  ;;  %v2598_v14 = vpack.c.bf16 %v2580_v31, %v2579_v40  ;;  %v2896_v4 = vld [vmem:[#allocation2 + $0xee] sm:$0xff]  ;;  %v2897_v40 = vld [vmem:[#allocation2 + $0xf6] sm:$0xff]  ;;  %v2898_v31 = vld [vmem:[#allocation2 + $0xfe] sm:$0xff] }
 0x112   : > { %4081 = vmatprep.mubr.msk.bf16.mxu0 %vm179_vm1, %v2595_v8  ;;  %v1617_v8 = vpack.c.bf16 %v1596_v61, %v1595_v57  ;;  %v2919_v5 = vpack.c.bf16 %v2896_v4, %v2895_v63 }
 0x117   : > { %3914 = vmatmul.mubr.msk.bf16.gmra.mrb[12].mxu1 %vm179_vm1, %v4866_v44  ;;  %v2873_v44 = vld [vmem:[#allocation2 + $0x36] sm:$0xff] }
 0x118   : > { %3917 = vmatprep.mubr.msk.bf16.mxu1 %vm179_vm1, %v4876_v53  ;;  %v2874_v53 = vld [vmem:[#allocation2 + $0x3e] sm:$0xff] }
 0x119   : > { %4082 = vmatmul.mubr.msk.bf16.gmra.mrb[28].mxu0 %vm179_vm1, %v2596_v11  ;;  %v2908_v6 = vpack.c.bf16 %v2874_v53, %v2873_v44  ;;  %v1599_v11 = vld [vmem:[#allocation2 + $0x113] sm:$0xff]  ;;  %v2920_v44 = vpack.c.bf16 %v2898_v31, %v2897_v40 }
 0x11a   : > { %4085 = vmatprep.mubr.msk.bf16.mxu0 %vm179_vm1, %v2597_v18  ;;  %v1600_v18 = vld [vmem:[#allocation2 + $0x11b] sm:$0xff] }
 0x11f   : > { %3918 = vmatmul.mubr.msk.bf16.gmra.mrb[16].mxu1 %vm179_vm1, %v4878_v56  ;;  %v2877_v56 = vld [vmem:[#allocation2 + $0x56] sm:$0xff] }
 0x120   : > { %3921 = vmatprep.mubr.msk.bf16.mxu1 %vm179_vm1, %v4886_v7  ;;  %v2878_v7 = vld [vmem:[#allocation2 + $0x5e] sm:$0xff] }
 0x121   : > { %4086 = vmatmul.mubr.msk.bf16.gmra.mrb[32].mxu0 %vm179_vm1, %v2598_v14  ;;  %v2910_v24 = vpack.c.bf16 %v2878_v7, %v2877_v56  ;;  %v2900_v14 = vld [vmem:[#allocation2 + $0x10e] sm:$0xff]  ;;  %v1620_v56 = vpack.c.bf16 %v1602_v20, %v1601_v26  ;;  %v2903_v7 = vld [vmem:[#allocation2 + $0x126] sm:$0xff] }
 0x122   : > { %4091 = vmatprep.mubr.msk.bf16.mxu0 %vm179_vm1, %v2907_v16  ;;  %v1619_v16 = vpack.c.bf16 %v1600_v18, %v1599_v11  ;;  %v2921_v53 = vpack.c.bf16 %v2900_v14, %v2899_v15 }
 0x127   : > { %3922 = vmatmul.mubr.msk.bf16.gmra.mrb[20].mxu1 %vm179_vm1, %v4888_v13  ;;  %v2881_v13 = vld [vmem:[#allocation2 + $0x76] sm:$0xff] }
 0x128   : > { %3925 = vmatprep.mubr.msk.bf16.mxu1 %vm179_vm1, %v4898_v21  ;;  %v2882_v21 = vld [vmem:[#allocation2 + $0x7e] sm:$0xff] }
 0x129   : > { %4092 = vmatmul.mubr.msk.bf16.vlgmr.msra.gmra.mrb[0].mxu0 %vm179_vm1, %v2908_v6  ;;  %v2912_v29 = vpack.c.bf16 %v2882_v21, %v2881_v13  ;;  %v2901_v6 = vld [vmem:[#allocation2 + $0x116] sm:$0xff]  ;;  %v2906_v13 = vld [vmem:[#allocation2 + $0x13e] sm:$0xff] }
 0x12a   : > { %4095 = vmatprep.mubr.msk.bf16.mxu0 %vm179_vm1, %v2909_v22  ;;  %v2902_v22 = vld [vmem:[#allocation2 + $0x11e] sm:$0xff] }
 0x12b   : > { %v2922_v27 = vpack.c.bf16 %v2902_v22, %v2901_v6 }
 0x12f   : > { %3926 = vmatmul.mubr.msk.bf16.gmra.mrb[24].mxu1 %vm179_vm1, %v4900_v23  ;;  %v1275_v23 = vld [vmem:[#allocation2 + $0x122] sm:$0xff] }
 0x130   : > { %3929 = vmatprep.mubr.msk.bf16.mxu1 %vm179_vm1, %v4908_v33  ;;  %v1587_v33 = vld [vmem:[#allocation2 + $0xb3] sm:$0xff]  ;;  %v1294_v37 = vpack.c.bf16 %v1276_v51, %v1275_v23 }
 0x131   : > { %4096 = vmatmul.mubr.msk.bf16.gmra.mrb[4].mxu0 %vm179_vm1, %v2910_v24  ;;  %v1613_v42 = vpack.c.bf16 %v1588_v62, %v1587_v33  ;;  %v2923_v24 = vpack.c.bf16 %v2904_v17, %v2903_v7 }
 0x132   : > { %4099 = vmatprep.mubr.msk.bf16.mxu0 %vm179_vm1, %v2911_v38  ;;  %v2905_v38 = vld [vmem:[#allocation2 + $0x136] sm:$0xff] }
 0x133   : > { %v2924_v21 = vpack.c.bf16 %v2906_v13, %v2905_v38 }
 0x137   : > { %3930 = vmatmul.mubr.msk.bf16.gmra.mrb[28].mxu1 %vm179_vm1, %v4910_v34  ;;  %v1589_v34 = vld [vmem:[#allocation2 + $0xc3] sm:$0xff] }
 0x138   : > { %3933 = vmatprep.mubr.msk.bf16.mxu1 %vm179_vm1, %v4918_v19  ;;  %v1590_v19 = vld [vmem:[#allocation2 + $0xcb] sm:$0xff] }
 0x139   : > { %4100 = vmatmul.mubr.msk.bf16.gmra.mrb[8].mxu0 %vm179_vm1, %v2912_v29  ;;  %v1614_v52 = vpack.c.bf16 %v1590_v19, %v1589_v34 }
 0x13a   : > { %4103 = vmatprep.mubr.msk.bf16.mxu0 %vm179_vm1, %v2913_v50 }
 0x13f   : > { %3934 = vmatmul.mubr.msk.bf16.gmra.mrb[32].mxu1 %vm179_vm1, %v1294_v37 }
 0x140   : > { %3959 = vmatprep.mubr.msk.bf16.mxu1 %vm179_vm1, %v1613_v42 }
 0x141   : > { %4104 = vmatmul.mubr.msk.bf16.gmra.mrb[12].mxu0 %vm179_vm1, %v2914_v43 }
 0x142   : > { %4107 = vmatprep.mubr.msk.bf16.mxu0 %vm179_vm1, %v2915_v47 }
 0x147   : > { %3960 = vmatmul.mubr.msk.bf16.vlgmr.msra.gmra.mrb[20].mxu1 %vm179_vm1, %v1614_v52 }
 0x148   : > { %3963 = vmatprep.mubr.msk.bf16.mxu1 %vm179_vm1, %v1615_v58 }
 0x149   : > { %4108 = vmatmul.mubr.msk.bf16.gmra.mrb[16].mxu0 %vm179_vm1, %v2916_v39 }
 0x14a   : > { %4111 = vmatprep.mubr.msk.bf16.mxu0 %vm179_vm1, %v2917_v59 }
 0x14f   : > { %3964 = vmatmul.mubr.msk.bf16.gmra.mrb[24].mxu1 %vm179_vm1, %v1616_v2 }
 0x150   : > { %3967 = vmatprep.mubr.msk.bf16.mxu1 %vm179_vm1, %v1617_v8 }
 0x151   : > { %4112 = vmatmul.mubr.msk.bf16.gmra.mrb[20].mxu0 %vm179_vm1, %v2918_v35 }
 0x152   : > { %4115 = vmatprep.mubr.msk.bf16.mxu0 %vm179_vm1, %v2919_v5 }
 0x157   : > { %3968 = vmatmul.mubr.msk.bf16.gmra.mrb[28].mxu1 %vm179_vm1, %v1618_v12 }
 0x158   : > { %3971 = vmatprep.mubr.msk.bf16.mxu1 %vm179_vm1, %v1619_v16 }
 0x159   : > { %4116 = vmatmul.mubr.msk.bf16.gmra.mrb[24].mxu0 %vm179_vm1, %v2920_v44 }
 0x15a   : > { %4119 = vmatprep.mubr.msk.bf16.mxu0 %vm179_vm1, %v2921_v53 }
 0x15f   : > { %3972 = vmatmul.mubr.msk.bf16.gmra.mrb[32].mxu1 %vm179_vm1, %v1620_v56 }
 0x161   : > { %4120 = vmatmul.mubr.msk.bf16.gmra.mrb[28].mxu0 %vm179_vm1, %v2922_v27 }
 0x162   : > { %4123 = vmatprep.mubr.msk.bf16.mxu0 %vm179_vm1, %v2923_v24 }
 0x169   : > { %4124 = vmatmul.mubr.msk.bf16.gmra.mrb[32].mxu0 %vm179_vm1, %v2924_v21 }
 0x1d2   : > { %v3903_v25 = vpop.f32.mrb[0].mxu1 }
 0x1d3   : > { %v1388_v28 = vpop.f32.mrb[1].mxu1 }
 0x1d4   : > { %v3904_v29 = vpop.f32.mrb[2].mxu1 }
 0x1d5   : > { %v1391_v50 = vpop.f32.mrb[3].mxu1 }
 0x1da   : > { %v3907_v23 = vpop.f32.mrb[4].mxu1 }
 0x1db   : > { %v1404_v51 = vpop.f32.mrb[5].mxu1 }
 0x1dc   : > { %v3908_v33 = vpop.f32.mrb[6].mxu1 }
 0x1dd   : > { %v1407_v62 = vpop.f32.mrb[7].mxu1 }
 0x1e2   : > { %v3911_v36 = vpop.f32.mrb[8].mxu1 }
 0x1e3   : > { %v1420_v0 = vpop.f32.mrb[9].mxu1 }
 0x1e4   : > { %v3912_v37 = vpop.f32.mrb[10].mxu1 }
 0x1e5   : > { %v1423_v1 = vpop.f32.mrb[11].mxu1 }
 0x1ea   : > { %v3915_v41 = vpop.f32.mrb[12].mxu1 }
 0x1eb   : > { %v1436_v42 = vpop.f32.mrb[13].mxu1 }
 0x1ec   : > { %v3916_v43 = vpop.f32.mrb[14].mxu1 }
 0x1ed   : > { %v1439_v47 = vpop.f32.mrb[15].mxu1 }
 0x1f2   : > { %v3919_v34 = vpop.f32.mrb[16].mxu1 }
 0x1f3   : > { %v1452_v19 = vpop.f32.mrb[17].mxu1 }
 0x1f4   : > { %v3920_v48 = vpop.f32.mrb[18].mxu1 }
 0x1f5   : > { %v4995_v32 = vpop.f32.mrb[19].mxu1 }
 0x1fc   : > { %v4093_v49 = vpop.f32.mrb[0].mxu0 }
 0x1fd   : > { %v4129_v45 = vadd.f32 %v4093_v49, %v3903_v25  ;;  %v3018_v52 = vpop.f32.mrb[1].mxu0 }
 0x1fe   : > { %v4130_v54 = vadd.f32 %v3018_v52, %v1388_v28  ;;  %v4094_v55 = vpop.f32.mrb[2].mxu0 }
 0x1ff   : > { %3199 = vst.msk [vmem:[%s5001_s14 + $0x10] sm:$0xff] %vm179_vm1, %v4129_v45  ;;  %v4131_v58 = vadd.f32 %v4094_v55, %v3904_v29  ;;  %v3021_v39 = vpop.f32.mrb[3].mxu0 }
 0x200   : > { %3197 = vst.msk [vmem:[%s5001_s14] sm:$0xff] %vm179_vm1, %v4130_v54  ;;  %v4132_v59 = vadd.f32 %v3021_v39, %v1391_v50 }
 0x201   : > { %3200 = vst.msk [vmem:[%s5001_s14 + $0x18] sm:$0xff] %vm179_vm1, %v4131_v58 }
 0x202   : > { %3198 = vst.msk [vmem:[%s5001_s14 + $0x8] sm:$0xff] %vm179_vm1, %v4132_v59 }
 0x204   : > { %v4097_v46 = vpop.f32.mrb[4].mxu0 }
 0x205   : > { %v4133_v60 = vadd.f32 %v4097_v46, %v3907_v23  ;;  %v3034_v57 = vpop.f32.mrb[5].mxu0 }
 0x206   : > { %v4134_v61 = vadd.f32 %v3034_v57, %v1404_v51  ;;  %v4098_v3 = vpop.f32.mrb[6].mxu0 }
 0x207   : > { %3203 = vst.msk [vmem:[%s5001_s14 + $0x30] sm:$0xff] %vm179_vm1, %v4133_v60  ;;  %v4135_v30 = vadd.f32 %v4098_v3, %v3908_v33  ;;  %v3037_v2 = vpop.f32.mrb[7].mxu0 }
 0x208   : > { %3201 = vst.msk [vmem:[%s5001_s14 + $0x20] sm:$0xff] %vm179_vm1, %v4134_v61  ;;  %v4136_v63 = vadd.f32 %v3037_v2, %v1407_v62 }
 0x209   : > { %3204 = vst.msk [vmem:[%s5001_s14 + $0x38] sm:$0xff] %vm179_vm1, %v4135_v30 }
 0x20a   : > { %3202 = vst.msk [vmem:[%s5001_s14 + $0x28] sm:$0xff] %vm179_vm1, %v4136_v63 }
 0x20c   : > { %v4101_v4 = vpop.f32.mrb[8].mxu0 }
 0x20d   : > { %v4137_v8 = vadd.f32 %v4101_v4, %v3911_v36  ;;  %v3050_v35 = vpop.f32.mrb[9].mxu0 }
 0x20e   : > { %v4138_v5 = vadd.f32 %v3050_v35, %v1420_v0  ;;  %v4102_v9 = vpop.f32.mrb[10].mxu0 }
 0x20f   : > { %3207 = vst.msk [vmem:[%s5001_s14 + $0x50] sm:$0xff] %vm179_vm1, %v4137_v8  ;;  %v4139_v10 = vadd.f32 %v4102_v9, %v3912_v37  ;;  %v3053_v11 = vpop.f32.mrb[11].mxu0 }
 0x210   : > { %3205 = vst.msk [vmem:[%s5001_s14 + $0x40] sm:$0xff] %vm179_vm1, %v4138_v5  ;;  %v4140_v18 = vadd.f32 %v3053_v11, %v1423_v1 }
 0x211   : > { %3208 = vst.msk [vmem:[%s5001_s14 + $0x58] sm:$0xff] %vm179_vm1, %v4139_v10 }
 0x212   : > { %3206 = vst.msk [vmem:[%s5001_s14 + $0x48] sm:$0xff] %vm179_vm1, %v4140_v18 }
 0x214   : > { %v4105_v40 = vpop.f32.mrb[12].mxu0 }
 0x215   : > { %v4141_v31 = vadd.f32 %v4105_v40, %v3915_v41  ;;  %v3066_v12 = vpop.f32.mrb[13].mxu0 }
 0x216   : > { %v4142_v15 = vadd.f32 %v3066_v12, %v1436_v42  ;;  %v4106_v14 = vpop.f32.mrb[14].mxu0 }
 0x217   : > { %3211 = vst.msk [vmem:[%s5001_s14 + $0x70] sm:$0xff] %vm179_vm1, %v4141_v31  ;;  %v4143_v16 = vadd.f32 %v4106_v14, %v3916_v43  ;;  %v3069_v44 = vpop.f32.mrb[15].mxu0 }
 0x218   : > { %3209 = vst.msk [vmem:[%s5001_s14 + $0x60] sm:$0xff] %vm179_vm1, %v4142_v15  ;;  %v4144_v53 = vadd.f32 %v3069_v44, %v1439_v47 }
 0x219   : > { %3212 = vst.msk [vmem:[%s5001_s14 + $0x78] sm:$0xff] %vm179_vm1, %v4143_v16 }
 0x21a   : > { %3210 = vst.msk [vmem:[%s5001_s14 + $0x68] sm:$0xff] %vm179_vm1, %v4144_v53  ;;  %v3961_v26 = vpop.f32.mrb[20].mxu1 }
 0x21b   : > { %v1794_v20 = vpop.f32.mrb[21].mxu1 }
 0x21c   : > { %v4109_v6 = vpop.f32.mrb[16].mxu0  ;;  %v3962_v22 = vpop.f32.mrb[22].mxu1 }
 0x21d   : > { %v4145_v56 = vadd.f32 %v4109_v6, %v3919_v34  ;;  %v3082_v7 = vpop.f32.mrb[17].mxu0  ;;  %v1797_v17 = vpop.f32.mrb[23].mxu1 }
 0x21e   : > { %v4146_v27 = vadd.f32 %v3082_v7, %v1452_v19  ;;  %v4110_v24 = vpop.f32.mrb[18].mxu0 }
 0x21f   : > { %3215 = vst.msk [vmem:[%s5001_s14 + $0x90] sm:$0xff] %vm179_vm1, %v4145_v56  ;;  %v4147_v38 = vadd.f32 %v4110_v24, %v3920_v48  ;;  %v3085_v13 = vpop.f32.mrb[19].mxu0 }
 0x220   : > { %3213 = vst.msk [vmem:[%s5001_s14 + $0x80] sm:$0xff] %vm179_vm1, %v4146_v27  ;;  %v4148_v21 = vadd.f32 %v3085_v13, %v4995_v32 }
 0x221   : > { %3216 = vst.msk [vmem:[%s5001_s14 + $0x98] sm:$0xff] %vm179_vm1, %v4147_v38 }
 0x222   : > { %3214 = vst.msk [vmem:[%s5001_s14 + $0x88] sm:$0xff] %vm179_vm1, %v4148_v21  ;;  %v3965_v25 = vpop.f32.mrb[24].mxu1 }
 0x223   : > { %v1810_v28 = vpop.f32.mrb[25].mxu1 }
 0x224   : > { %v4113_v29 = vpop.f32.mrb[20].mxu0  ;;  %v3966_v50 = vpop.f32.mrb[26].mxu1 }
 0x225   : > { %v4149_v23 = vadd.f32 %v4113_v29, %v3961_v26  ;;  %v3098_v51 = vpop.f32.mrb[21].mxu0  ;;  %v1813_v33 = vpop.f32.mrb[27].mxu1 }
 0x226   : > { %v4150_v62 = vadd.f32 %v3098_v51, %v1794_v20  ;;  %v4114_v36 = vpop.f32.mrb[22].mxu0 }
 0x227   : > { %3219 = vst.msk [vmem:[%s5001_s14 + $0xb0] sm:$0xff] %vm179_vm1, %v4149_v23  ;;  %v4151_v0 = vadd.f32 %v4114_v36, %v3962_v22  ;;  %v3101_v37 = vpop.f32.mrb[23].mxu0 }
 0x228   : > { %3217 = vst.msk [vmem:[%s5001_s14 + $0xa0] sm:$0xff] %vm179_vm1, %v4150_v62  ;;  %v4152_v1 = vadd.f32 %v3101_v37, %v1797_v17 }
 0x229   : > { %3220 = vst.msk [vmem:[%s5001_s14 + $0xb8] sm:$0xff] %vm179_vm1, %v4151_v0 }
 0x22a   : > { %3218 = vst.msk [vmem:[%s5001_s14 + $0xa8] sm:$0xff] %vm179_vm1, %v4152_v1  ;;  %v3969_v41 = vpop.f32.mrb[28].mxu1 }
 0x22b   : > { %v1826_v42 = vpop.f32.mrb[29].mxu1 }
 0x22c   : > { %v4117_v43 = vpop.f32.mrb[24].mxu0  ;;  %v3970_v47 = vpop.f32.mrb[30].mxu1 }
 0x22d   : > { %v4153_v34 = vadd.f32 %v4117_v43, %v3965_v25  ;;  %v3114_v19 = vpop.f32.mrb[25].mxu0  ;;  %v1829_v48 = vpop.f32.mrb[31].mxu1 }
 0x22e   : > { %v4154_v32 = vadd.f32 %v3114_v19, %v1810_v28  ;;  %v4118_v49 = vpop.f32.mrb[26].mxu0 }
 0x22f   : > { %3223 = vst.msk [vmem:[%s5001_s14 + $0xd0] sm:$0xff] %vm179_vm1, %v4153_v34  ;;  %v4155_v45 = vadd.f32 %v4118_v49, %v3966_v50  ;;  %v3117_v52 = vpop.f32.mrb[27].mxu0 }
 0x230   : > { %3221 = vst.msk [vmem:[%s5001_s14 + $0xc0] sm:$0xff] %vm179_vm1, %v4154_v32  ;;  %v4156_v54 = vadd.f32 %v3117_v52, %v1813_v33 }
 0x231   : > { %3224 = vst.msk [vmem:[%s5001_s14 + $0xd8] sm:$0xff] %vm179_vm1, %v4155_v45 }
 0x232   : > { %3222 = vst.msk [vmem:[%s5001_s14 + $0xc8] sm:$0xff] %vm179_vm1, %v4156_v54  ;;  %v3973_v55 = vpop.f32.mrb[32].mxu1 }
 0x233   : > { %v1842_v58 = vpop.f32.mrb[33].mxu1 }
 0x234   : > { %v4121_v39 = vpop.f32.mrb[28].mxu0  ;;  %v3974_v59 = vpop.f32.mrb[34].mxu1 }
 0x235   : > { %v4157_v46 = vadd.f32 %v4121_v39, %v3969_v41  ;;  %v3130_v60 = vpop.f32.mrb[29].mxu0  ;;  %v1845_v57 = vpop.f32.mrb[35].mxu1 }
 0x236   : > { %v4158_v61 = vadd.f32 %v3130_v60, %v1826_v42  ;;  %v4122_v3 = vpop.f32.mrb[30].mxu0 }
 0x237   : > { %3227 = vst.msk [vmem:[%s5001_s14 + $0xf0] sm:$0xff] %vm179_vm1, %v4157_v46  ;;  %v4159_v30 = vadd.f32 %v4122_v3, %v3970_v47  ;;  %v3133_v2 = vpop.f32.mrb[31].mxu0 }
 0x238   : > { %3225 = vst.msk [vmem:[%s5001_s14 + $0xe0] sm:$0xff] %vm179_vm1, %v4158_v61  ;;  %v4160_v63 = vadd.f32 %v3133_v2, %v1829_v48 }
 0x239   : > { %3228 = vst.msk [vmem:[%s5001_s14 + $0xf8] sm:$0xff] %vm179_vm1, %v4159_v30 }
 0x23a   : > { %3226 = vst.msk [vmem:[%s5001_s14 + $0xe8] sm:$0xff] %vm179_vm1, %v4160_v63 }
 0x23c   : > { %v4125_v4 = vpop.f32.mrb[32].mxu0 }
 0x23d   : > { %v4161_v8 = vadd.f32 %v4125_v4, %v3973_v55  ;;  %v3146_v35 = vpop.f32.mrb[33].mxu0 }
 0x23e   : > { %v4162_v5 = vadd.f32 %v3146_v35, %v1842_v58  ;;  %v4126_v9 = vpop.f32.mrb[34].mxu0 }
 0x23f   : > { %3231 = vst.msk [vmem:[%s5001_s14 + $0x110] sm:$0xff] %vm179_vm1, %v4161_v8  ;;  %v4163_v10 = vadd.f32 %v4126_v9, %v3974_v59  ;;  %v3149_v11 = vpop.f32.mrb[35].mxu0 }
 0x240   : > { %3229 = vst.msk [vmem:[%s5001_s14 + $0x100] sm:$0xff] %vm179_vm1, %v4162_v5  ;;  %v4164_v18 = vadd.f32 %v3149_v11, %v1845_v57 }
 0x241   : > { %3232 = vst.msk [vmem:[%s5001_s14 + $0x118] sm:$0xff] %vm179_vm1, %v4163_v10 }
 0x242   : > { %3230 = vst.msk [vmem:[%s5001_s14 + $0x108] sm:$0xff] %vm179_vm1, %v4164_v18 }
 0x243 PF: > { %s12_s11 = sadd.s32 1, %s4475_s11   ;;  %s5088_s9 = smov %s4471_s10 }
 0x244   : > { %p9_p5 = scmp.ge.s32.totalorder %s12_s11, 4   ;;  %s5089_s10 = smov %s5091_s12 }
 0x246   :  { %11 = sbr.rel (!%p9_p5) target bundleno = 2 (0x2), region = 84 }

</bundles_post_ra>
